<compile_context>
chip_gen: v7x
topology: tpu7x:2x2x1
jax: 0.10.0
libtpu: 0.0.40
codegen_flags: <defaults>
</compile_context>

<pallas_src>
import functools

import jax
import jax.numpy as jnp
from jax import lax
from jax.experimental import pallas as pl
from jax.experimental.pallas import tpu as pltpu


# ---------------------------------------------------------------------------
# Kernel 1: time-independent input projection  xg = conv_x(X) + bias
# as one lane-dense matmul over the im2col'ed input (all timesteps at once).
# Operands are bf16, accumulation f32.
# ---------------------------------------------------------------------------
def xproj_kernel(xcol_ref, wxf_ref, bias_ref, xg_ref):
    xg_ref[...] = (
        jnp.dot(xcol_ref[...], wxf_ref[...], preferred_element_type=jnp.float32)
        + bias_ref[0, :]
    )


# ---------------------------------------------------------------------------
# Kernel 2: full recurrence for one batch element.  grid = (B,) ("parallel" so the
# two v7x TensorCores each take one batch element with private scratch).  Time is a
# fully unrolled in-kernel loop; the recurrent H state lives in VMEM scratch in
# tap-replicated layout so the recurrent conv is a single deep K = k*k*Cout matmul.
# ---------------------------------------------------------------------------
def convlstm_recurrence_kernel(xg_ref, whf_ref, wc_ref, out_ref,
                               hcat_ref, c_ref, *, k, pad, Hh, Ww, Cout, T):
    M = Hh * Ww

    # Fresh recurrence for this batch block: zero the tap-replicated H state and C.
    # (Tap slots outside the valid shifted windows stay zero forever == zero padding.)
    hcat_ref[...] = jnp.zeros(hcat_ref.shape, hcat_ref.dtype)
    c_ref[...] = jnp.zeros(c_ref.shape, c_ref.dtype)

    # Static scatter windows: tap (dy, dx) at output (y, x) must hold h[y+dy-pad, x+dx-pad].
    windows = []
    for dy in range(k):
        for dx in range(k):
            dy0, dy1 = max(0, pad - dy), min(Hh, Hh + pad - dy)
            dx0, dx1 = max(0, pad - dx), min(Ww, Ww + pad - dx)
            windows.append((dy0, dy1, dx0, dx1, dy0 + dy - pad, dx0 + dx - pad))

    # Time loop inside the kernel (T is small & static -> fully unrolled).
    for t in range(T):
        # Recurrent conv: one deep MXU matmul, bf16 operands, f32 accumulation.
        hcat = hcat_ref[...].reshape(M, k * k * Cout).astype(jnp.bfloat16)
        acc = xg_ref[t] + jnp.dot(hcat, whf_ref[...],
                                  preferred_element_type=jnp.float32)

        # Gate order matches torch.chunk(conv_out, 4, dim=1): i, f, g (candidate), o.
        c_prev = c_ref[...]
        i_gate = jax.nn.sigmoid(acc[:, 0 * Cout:1 * Cout] + wc_ref[0] * c_prev)
        f_gate = jax.nn.sigmoid(acc[:, 1 * Cout:2 * Cout] + wc_ref[1] * c_prev)
        g_cand = jnp.tanh(acc[:, 2 * Cout:3 * Cout])
        c_new = f_gate * c_prev + i_gate * g_cand
        o_gate = jax.nn.sigmoid(acc[:, 3 * Cout:4 * Cout] + wc_ref[2] * c_new)
        h_new = o_gate * jnp.tanh(c_new)

        c_ref[...] = c_new
        out_ref[t] = h_new
        # TODO(synk): a lane-dense (Hh, Ww*Cout) output store would need a per-step
        # sublane->lane relayout of h_new; kept the natural (M, Cout) store since the
        # tap scatter below dominates store traffic at these shapes.

        # Scatter h_t into its k*k channel slots of the tap-replicated recurrent state
        # (fuses the next step's im2col into this step's state update).
        h3 = h_new.reshape(Hh, Ww, Cout)
        for tap, (dy0, dy1, dx0, dx1, sy0, sx0) in enumerate(windows):
            hcat_ref[dy0:dy1, dx0:dx1, tap * Cout:(tap + 1) * Cout] = (
                h3[sy0:sy0 + (dy1 - dy0), sx0:sx0 + (dx1 - dx0), :])


def convlstm_forward(x, params, *, kernel_size, padding):
    """x: (B, C_in, T, H, W) float32  ->  (B, C_out, T, H, W) float32."""
    B, Cin, T, Hh, Ww = x.shape
    wx, wh, bias, wci, wcf, wco = params
    k, p = kernel_size, padding
    Cout = wci.shape[-1]
    M = Hh * Ww

    # ---- glue: layout + one-time im2col of the input (pure data movement) ----
    x_nhwc = jnp.transpose(x, (0, 2, 3, 4, 1))                         # (B,T,H,W,Cin)
    xpad = jnp.pad(x_nhwc, ((0, 0), (0, 0), (p, p), (p, p), (0, 0)))
    xtaps = [xpad[:, :, dy:dy + Hh, dx:dx + Ww, :]
             for dy in range(k) for dx in range(k)]
    xcol = jnp.concatenate(xtaps, axis=-1).reshape(B * T * M, k * k * Cin)
    xcol = xcol.astype(jnp.bfloat16)                                   # bf16 MXU operand
    # TODO(synk): at realistic Cin/H/W/T, fuse the k*k tap expansion into the kernel
    # (or use lax.conv for conv_x) instead of materializing the k*k x im2col in HBM.

    wxf = wx.reshape(k * k * Cin, 4 * Cout).astype(jnp.bfloat16)
    whf = wh.reshape(k * k * Cout, 4 * Cout).astype(jnp.bfloat16)
    wc = jnp.stack([wci, wcf, wco]).reshape(3, M, Cout)                # f32 peepholes

    vmem_cap = 32 * 1024 * 1024   # explicit scoped-VMEM cap, safe on v5e/v6e/v7x

    # ---- kernel 1: input projection for all timesteps at once ----
    tm = T * M
    xg2d = pl.pallas_call(
        xproj_kernel,
        out_shape=jax.ShapeDtypeStruct((B * tm, 4 * Cout), jnp.float32),
        grid_spec=pltpu.PrefetchScalarGridSpec(
            num_scalar_prefetch=0,
            grid=(B,),
            in_specs=[
                pl.BlockSpec((tm, k * k * Cin), lambda i: (i, 0)),
                pl.BlockSpec((k * k * Cin, 4 * Cout), lambda i: (0, 0)),
                pl.BlockSpec((1, 4 * Cout), lambda i: (0, 0)),
            ],
            out_specs=pl.BlockSpec((tm, 4 * Cout), lambda i: (i, 0)),
        ),
        compiler_params=pltpu.CompilerParams(
            dimension_semantics=("parallel",), vmem_limit_bytes=vmem_cap),
    )(xcol, wxf, bias)
    xg = xg2d.reshape(B, T, M, 4 * Cout)                               # f32 gate slab

    # ---- kernel 2: recurrence; grid = (B,), time loops inside the kernel ----
    kern = functools.partial(convlstm_recurrence_kernel, k=k, pad=p,
                             Hh=Hh, Ww=Ww, Cout=Cout, T=T)
    out = pl.pallas_call(
        kern,
        out_shape=jax.ShapeDtypeStruct((B, T, M, Cout), jnp.float32),
        grid_spec=pltpu.PrefetchScalarGridSpec(
            num_scalar_prefetch=0,
            grid=(B,),
            in_specs=[
                pl.BlockSpec((pl.Squeezed(), T, M, 4 * Cout),
                             lambda b: (b, 0, 0, 0)),
                pl.BlockSpec((k * k * Cout, 4 * Cout), lambda b: (0, 0)),
                pl.BlockSpec((3, M, Cout), lambda b: (0, 0, 0)),
            ],
            out_specs=pl.BlockSpec((pl.Squeezed(), T, M, Cout),
                                   lambda b: (b, 0, 0, 0)),
            scratch_shapes=[
                pltpu.VMEM((Hh, Ww, k * k * Cout), jnp.float32),  # tap-replicated H
                pltpu.VMEM((M, Cout), jnp.float32),               # cell state C
            ],
        ),
        compiler_params=pltpu.CompilerParams(
            dimension_semantics=("parallel",), vmem_limit_bytes=vmem_cap),
    )(xg, whf, wc)

    out = out.reshape(B, T, Hh, Ww, Cout)
    return jnp.transpose(out, (0, 4, 1, 2, 3))                         # (B,Cout,T,H,W)


def convlstm_ref(x, params, *, kernel_size, padding):
    """Pure-JAX f32 reference (lax.conv + scan), same parameter conventions."""
    B, Cin, T, Hh, Ww = x.shape
    wx, wh, bias, wci, wcf, wco = params
    k = kernel_size
    Cout = wci.shape[-1]
    wx_hwio = wx.reshape(k, k, Cin, 4 * Cout)
    wh_hwio = wh.reshape(k, k, Cout, 4 * Cout)
    dn = ('NHWC', 'HWIO', 'NHWC')
    pads = [(padding, padding), (padding, padding)]

    x_nhwc = jnp.transpose(x, (0, 2, 3, 4, 1))            # (B, T, H, W, Cin)
    xs = jnp.transpose(x_nhwc, (1, 0, 2, 3, 4))           # (T, B, H, W, Cin)

    def step(carry, xt):
        h, c = carry
        conv = lax.conv_general_dilated(xt, wx_hwio, (1, 1), pads, dimension_numbers=dn)
        conv = conv + lax.conv_general_dilated(h, wh_hwio, (1, 1), pads, dimension_numbers=dn)
        conv = conv + bias[0]
        i_c, f_c, g_c, o_c = jnp.split(conv, 4, axis=-1)
        i = jax.nn.sigmoid(i_c + wci * c)
        f = jax.nn.sigmoid(f_c + wcf * c)
        c_new = f * c + i * jnp.tanh(g_c)
        o = jax.nn.sigmoid(o_c + wco * c_new)
        h_new = o * jnp.tanh(c_new)
        return (h_new, c_new), h_new

    h0 = jnp.zeros((B, Hh, Ww, Cout), jnp.float32)
    c0 = jnp.zeros((B, Hh, Ww, Cout), jnp.float32)
    _, ys = lax.scan(step, (h0, c0), xs)                   # (T, B, H, W, Cout)
    return jnp.transpose(ys, (1, 4, 0, 2, 3))              # (B, Cout, T, H, W)


def init_params(key, *, in_channels, out_channels, kernel_size, frame_size):
    """Deterministic synthetic init matching ConvLSTMCell parameter shapes."""
    k = kernel_size
    Cin, Cout = in_channels, out_channels
    Hh, Ww = frame_size
    k_wx, k_wh, k_b, k_ci, k_cf, k_co = jax.random.split(key, 6)
    scale = 0.1
    # nn.Conv2d(Cin+Cout, 4*Cout, k) weight split into X-part and H-part, stored as
    # (k*k, C, 4*Cout) matmul taps in channels-last order.
    wx = scale * jax.random.normal(k_wx, (k * k, Cin, 4 * Cout), jnp.float32)
    wh = scale * jax.random.normal(k_wh, (k * k, Cout, 4 * Cout), jnp.float32)
    bias = scale * jax.random.normal(k_b, (1, 4 * Cout), jnp.float32)
    # Peephole weights W_ci/W_cf/W_co: PyTorch shape (Cout, H, W) -> channels-last (H, W, Cout).
    wci = scale * jax.random.normal(k_ci, (Hh, Ww, Cout), jnp.float32)
    wcf = scale * jax.random.normal(k_cf, (Hh, Ww, Cout), jnp.float32)
    wco = scale * jax.random.normal(k_co, (Hh, Ww, Cout), jnp.float32)
    return (wx, wh, bias, wci, wcf, wco)


if __name__ == "__main__":
    # Small shapes consistent with the module's forward: x is (B, C_in, T, H, W).
    B, Cin, Cout, T, Hh, Ww = 2, 4, 32, 8, 16, 16
    kernel_size, padding = 3, 1

    key = jax.random.PRNGKey(0)
    kx, kp = jax.random.split(key)
    x = jax.random.normal(kx, (B, Cin, T, Hh, Ww), jnp.float32)
    params = init_params(kp, in_channels=Cin, out_channels=Cout,
                         kernel_size=kernel_size, frame_size=(Hh, Ww))

    out = convlstm_forward(x, params, kernel_size=kernel_size, padding=padding)
    out = jax.block_until_ready(out)
    assert out.shape == (B, Cout, T, Hh, Ww)

    ref = jax.block_until_ready(convlstm_ref(x, params, kernel_size=kernel_size,
                                             padding=padding))
    # bf16 MXU operands (f32 accumulation) in the kernels vs. a pure-f32 reference:
    # tolerate small elementwise noise, catch any structural/ordering bug.
    err = jnp.abs(out - ref)
    max_err = float(jnp.max(err))
    mean_err = float(jnp.mean(err))
    assert mean_err < 5e-3, f"mean mismatch vs reference: {mean_err}"
    assert max_err < 1e-1, f"max mismatch vs reference: {max_err}"

    print("KERNEL_OK")
</pallas_src>

<mosaic_0001>
module attributes {stable_mosaic.version = 11 : i64} {
  func.func @xproj_kernel(%arg0: i32, %arg1: memref<2048x36xbf16, #tpu.memory_space<vmem>>, %arg2: memref<36x128xbf16, #tpu.memory_space<vmem>>, %arg3: memref<1x128xf32, #tpu.memory_space<vmem>>, %arg4: memref<2048x128xf32, #tpu.memory_space<vmem>>) attributes {dimension_semantics = [#tpu.dimension_semantics<parallel>], iteration_bounds = array<i64: 2>, scalar_prefetch = 0 : i64, scratch_operands = 0 : i64, tpu.core_type = #tpu.core_type<tc>, window_params = [{transform_indices = @transform_0, window_bounds = array<i64: 2048, 36>}, {pipeline_mode = #tpu.pipeline_mode<synchronous>, transform_indices = @transform_1, window_bounds = array<i64: 36, 128>}, {pipeline_mode = #tpu.pipeline_mode<synchronous>, transform_indices = @transform_2, window_bounds = array<i64: 1, 128>}, {transform_indices = @transform_3, window_bounds = array<i64: 2048, 128>}]} {
    %c0 = arith.constant 0 : index
    %c0_0 = arith.constant 0 : index
    %0 = vector.load %arg1[%c0, %c0_0] : memref<2048x36xbf16, #tpu.memory_space<vmem>>, vector<2048x36xbf16>
    %c0_1 = arith.constant 0 : index
    %c0_2 = arith.constant 0 : index
    %1 = vector.load %arg2[%c0_1, %c0_2] : memref<36x128xbf16, #tpu.memory_space<vmem>>, vector<36x128xbf16>
    %cst = arith.constant dense<0.000000e+00> : vector<2048x128xf32>
    %2 = tpu.matmul %0, %1, %cst {dimension_numbers = #tpu.dot_dimension_numbers<[1], [0], [0], [1], [0, 0, 1, 1], [], []>} : vector<2048x36xbf16>, vector<36x128xbf16>, vector<2048x128xf32> -> vector<2048x128xf32>
    %c0_3 = arith.constant 0 : index
    %c0_4 = arith.constant 0 : index
    %3 = vector.load %arg3[%c0_3, %c0_4] : memref<1x128xf32, #tpu.memory_space<vmem>>, vector<1x128xf32>
    %4 = vector.shape_cast %3 : vector<1x128xf32> to vector<128xf32>
    %5 = vector.shape_cast %4 : vector<128xf32> to vector<1x128xf32>
    %6 = vector.broadcast %5 : vector<1x128xf32> to vector<2048x128xf32>
    %7 = arith.addf %2, %6 : vector<2048x128xf32>
    %c0_5 = arith.constant 0 : index
    %c0_6 = arith.constant 0 : index
    %8 = vector.load %arg4[%c0_5, %c0_6] : memref<2048x128xf32, #tpu.memory_space<vmem>>, vector<2048x128xf32>
    tpu.vector_store %arg4[%c0_5, %c0_6], %7 {strides = array<i32>} : memref<2048x128xf32, #tpu.memory_space<vmem>>, vector<2048x128xf32>,
    return
  }
  func.func @transform_0(%arg0: i32) -> (i32, i32) {
    %c0_i32 = arith.constant 0 : i32
    %c0_i32_0 = arith.constant 0 : i32
    return %arg0, %c0_i32 : i32, i32
  }
  func.func @transform_1(%arg0: i32) -> (i32, i32) {
    %c0_i32 = arith.constant 0 : i32
    %c0_i32_0 = arith.constant 0 : i32
    %c0_i32_1 = arith.constant 0 : i32
    return %c0_i32, %c0_i32_0 : i32, i32
  }
  func.func @transform_2(%arg0: i32) -> (i32, i32) {
    %c0_i32 = arith.constant 0 : i32
    %c0_i32_0 = arith.constant 0 : i32
    %c0_i32_1 = arith.constant 0 : i32
    return %c0_i32, %c0_i32_0 : i32, i32
  }
  func.func @transform_3(%arg0: i32) -> (i32, i32) {
    %c0_i32 = arith.constant 0 : i32
    %c0_i32_0 = arith.constant 0 : i32
    return %arg0, %c0_i32 : i32, i32
  }
}

</mosaic_0001>

<bundles_post_ra>
// kernel: tpu_custom_call.1
= control target key start
LH: loop header
LB: loop body
LE: loop exit
PB: predicated region body
PF: predicated region fallthrough
CT: control target
= control target key end

     0   :  { %8 = vsyncpa [#allocation3], 0  ;;  %s4909_s0 = inlined_call_operand.vmem [shape: bf16[4096,36], index: 0, kind: input, shape index: {}]   ;;  %s4910_s1 = inlined_call_operand.hbm [shape: bf16[36,128], index: 1, kind: input, shape index: {}]   ;;  %s4911_s2 = inlined_call_operand.hbm [shape: f32[1,128], index: 2, kind: input, shape index: {}]   ;;  %s4912_s3 = inlined_call_operand.hbm [shape: f32[4096,128], index: 3, kind: output, shape index: {}]  }
   0x1   :  { %9 = vsyncpa [#allocation6], 0 }
   0x2   :  { %10 = vsyncpa [#allocation4], 0 }
   0x3   :  { %12 = vsyncpa [#allocation4 + $0x1], 0  ;;  %s3953_s12 = smov 0   ;;  %s3955_s13 = smov 0  }
   0x4   :  { %s3957_s14 = smov 0   ;;  %s3959_s15 = smov 0  }
   0x5 LB: > { %s3974_s16 = sadd.s32 4294967295, %s3924_s15   ;;  %s2924_s17 = sadd.s32 4294967294, %s3924_s15   ;;  %s3924_s15 = sphi %s3959_s15, %s4930_s15   ;;  %s3920_s14 = sphi %s3957_s14, %s4929_s14   ;;  %s3916_s13 = sphi %s3955_s13, %s4928_s13   ;;  %s3912_s12 = sphi %s3953_s12, %s4927_s12  }
   0x6   : > { %s3978_s18 = sadd.s32 1, %s3924_s15   ;;  %s93_s19 = sadd.s32 1, %s3920_s14 }
   0x7   : > { %s90_s20 = ssub.s32 %s3924_s15, %s3978_s18  ;;  %p103_p0 = scmp.ne.s32.totalorder %s3920_s14, %s3916_s13 }
   0x8   : > { %p91_p1 = scmp.eq.s32.totalorder %s90_s20, 0  ;;  %p104_p2 = scmp.eq.s32.totalorder %s3974_s16, 1 }
   0x9   : > { %p109_p3 = scmp.ne.s32.totalorder %s3916_s13, %s3912_s12  ;;  %p110_p4 = scmp.eq.s32.totalorder %s2924_s17, 1 }
   0xa   : > { %s3989_s21 = scalar_select %p91_p1, %s3920_s14, %s93_s19  }
   0xb   : > { %p3991_p5 = por %p104_p2, %p103_p0  ;;  %p3995_p6 = por %p110_p4, %p109_p3 }
   0xc   : > { %p2925_p7 = scmp.ge.s32.totalorder %s3924_s15, 1  ;;  %p117_p8 = scmp.lt.s32.totalorder %s3924_s15, 3 }
   0xd   : > { %s4916_s22 = scalar_select %p3991_p5, 1, 0 }
   0xe   : > { %s4917_s23 = scalar_select %p3995_p6, 1, 0 }
   0xf   : > { %p4913_p9 = scmp.eq.s32.totalorder %s3974_s16, 0  ;;  %p4002_p10 = pnand %p2925_p7, %p117_p8 }
  0x10   : > { %s3926_s25 = smov [#allocation2]   ;;  %s3927_s28 = smov [#allocation5]  }
  0x11   : > { %s4918_s24 = scalar_select %p4002_p10, 1, 0 }
  0x12   : > { %s129_s26 = sshll.u32 %s3926_s25, 4  ;;  %p3612_p11 = pneg %p4002_p10  ;;  %s130_s26 = int_to_ptr.vmem [resolvable:$true] %s129_s26 }
  0x13   : > { %s143_s29 = sshll.u32 %s3927_s28, 4  ;;  %s3798_s5 = scalar_lea.hbm %s4910_s1, 320  ;;  %s4014_s29 = int_to_ptr.vmem [resolvable:$true] %s143_s29 }
  0x14   : > { %p4010_p12 = pnand %p4913_p9, %p3612_p11  ;;  %p3799_p13 = scmp.ne.s32.totalorder %s4910_s1, %s3798_s5 }
  0x15   : > { %p3805_p3 = scmp.lt.u32.totalorder %s3798_s5, %s4910_s1 }
  0x16   : > { %p3800_p0 = pneg %p4010_p12 }
  0x18   : > { %p3801_p1 = pnand %p3800_p0, %p3799_p13 }
  0x1a   : > { %p3802_p2 = pneg %p3801_p1 }
  0x1c   : > { %p3807_p4 = pnand %p3805_p3, %p3802_p2 }
  0x1e   : > { %3810 = shalt.err (!%p3807_p4)
}
  0x1f   : > { %s3811_s10 = scalar_lea.vmem %s130_s26, 320  ;;  %p3819_p9 = scmp.lt.s32.totalorder %s130_s26, %s130_s26 }
  0x20   : > { %p3812_p7 = scmp.ne.s32.totalorder %s130_s26, %s3811_s10  ;;  %p3820_p6 = scmp.lt.s32.totalorder %s3811_s10, %s3811_s10 }
  0x22   : > { %p3814_p8 = pnand %p3812_p7, %p3800_p0  ;;  %p3821_p5 = por %p3820_p6, %p3819_p9 }
  0x24   : > { %p3815_p11 = pneg %p3814_p8 }
  0x26   : > { %p3822_p10 = pnand %p3821_p5, %p3815_p11 }
  0x28   : > { %3825 = shalt.err (!%p3822_p10)
}
  0x29   : > { %s3928_s11 = smov 64   ;;  %s3929_s17 = smov 4  }
  0x2a   : > { %3615 = dma.hbm_to_vmem [thread:$0]  (!%p4010_p12), %s4910_s1, 320, %s130_s26, [#allocation3], %s3928_s11, %s3928_s11, %s3929_s17  }
  0x2b   : > { %s3826_s30 = scalar_lea.hbm %s4911_s2, 16 }
  0x2c   : > { %p3827_p13 = scmp.ne.s32.totalorder %s4911_s2, %s3826_s30  ;;  %p3833_p9 = scmp.lt.u32.totalorder %s3826_s30, %s4911_s2 }
  0x2e   : > { %p3829_p5 = pnand %p3827_p13, %p3800_p0 }
  0x30   : > { %p3830_p6 = pneg %p3829_p5 }
  0x32   : > { %p3835_p10 = pnand %p3833_p9, %p3830_p6 }
  0x34   : > { %3838 = shalt.err (!%p3835_p10)
}
  0x35   : > { %s3839_s26 = scalar_lea.vmem %s4014_s29, 16  ;;  %s3846_s8 = scalar_lea.vmem %s4014_s29, 32 }
  0x36   : > { %p3840_p1 = scmp.ne.s32.totalorder %s4014_s29, %s3839_s26  ;;  %p3847_p4 = scmp.lt.s32.totalorder %s4014_s29, %s4014_s29 }
  0x37   : > { %p3848_p7 = scmp.lt.s32.totalorder %s3846_s8, %s3839_s26 }
  0x38   : > { %p3842_p2 = pnand %p3840_p1, %p3800_p0 }
  0x39   : > { %p3849_p8 = por %p3848_p7, %p3847_p4 }
  0x3a   : > { %p3843_p3 = pneg %p3842_p2 }
  0x3c   : > { %p3850_p11 = pnand %p3849_p8, %p3843_p3 }
  0x3e   : > { %3853 = shalt.err (!%p3850_p11)
}
  0x3f   : > { %3618 = dma.hbm_to_vmem [thread:$0]  (!%p4010_p12), %s4911_s2, 16, %s4014_s29, [#allocation6]  }
  0x40   : > { %p4920_p13 = scmp.ne.s32.totalorder %s4918_s24, 0 }
  0x41   : > { %p4921_p0 = scmp.eq.s32.totalorder (!%p4920_p13), %s3974_s16, 0 }
  0x42   : > { %165 = sbr.rel (%p4920_p13) target bundleno = 570 (0x23a), region = 32 }
  0x49   : > { %3899 = dma.done.wait (%p4921_p0), [#allocation3], 320   ;;  %p4922_p5 = pmov %p4921_p0 }
  0x4a   : > { %p4923_p6 = pmov %p4921_p0 }
  0x4b   : > { %3901 = vsyncadd (%p4922_p5), [#allocation3], 4294966976 }
  0x4c   : > { %3903 = dma.done.wait (%p4923_p6), [#allocation6], 16   ;;  %p4924_p9 = pmov %p4921_p0 }
  0x4d   : > { %s2933_s27 = sshll.u32 %s3974_s16, 8  ;;  %v3666_v0 = vld [vmem:[#allocation2] sm:$0xff]   ;;  %v3667_v1 = vld [vmem:[#allocation2 + $0x8] sm:$0xff]   ;;  %vm1124_vm0 = vcmask 293888   ;;  %vm1509_vm1 = vcmask 1041408   ;;  %s190_s19 = sand.u32 1, %s3916_s13  }
  0x4e   : > { %3905 = vsyncadd (%p4924_p9), [#allocation6], 4294967280  ;;  %p194_p10 = scmp.lt.s32.totalorder %s2933_s27, 511  ;;  %3332 = vmatprep.subr.bf16.mxu0 %v3666_v0  ;;  %3594 = vmatprep.subr.bf16.mxu1 %v3666_v0  ;;  %v3668_v2 = vld [vmem:[#allocation2 + $0x10] ss:$0 sps:$4 sm:$0x33]  }
  0x4f   : > { %3333 = vmatpush3.bf16.msra.mxu0 %v3666_v0  ;;  %3597 = vmatpush3.bf16.msra.mxu1 %v3666_v0  ;;  %v1511_v5 = vsel %vm1509_vm1, %v3668_v2, 0  ;;  %s2932_s20 = sshll.u32 %s190_s19, 11  ;;  %s3200_s28 = sshll.u32 %s3974_s16, 15 }
  0x50   : > { %s4932_s27 = smov (!%p194_p10, %s2933_s27), 511  ;;  %3334 = vmatprep.subr.bf16.mxu0 %v3667_v1  ;;  %3595 = vmatprep.subr.bf16.mxu1 %v3667_v1  ;;  %s4313_s25 = scalar_lea.vmem [#allocation7], %s2932_s20 }
  0x51   : > { %s2934_s29 = sshll.u32 %s4932_s27, 2  ;;  %s2840_s30 = sshll.u32 %s4313_s25, 4  ;;  %s4856_s30 = int_to_ptr.vmem [resolvable:$true] %s2840_s30 }
  0x52   : > { %s4078_s17 = scalar_lea.vmem %s4909_s0, %s2934_s29  ;;  %s4854_s5 = scalar_lea.hbm %s4912_s3, %s3200_s28 }
  0x53   : > { %v3669_v3 = vld [vmem:[%s4078_s17] sm:$0xff]   ;;  %3335 = vmatpush3.bf16.msra.mxu0 %v3667_v1  ;;  %3598 = vmatpush3.bf16.msra.mxu1 %v3667_v1  ;;  %v3671_v6 = vld [vmem:[%s4078_s17 + $0x8] sm:$0xff]   ;;  %v3673_v8 = vld [vmem:[%s4078_s17 + $0x10] sm:$0xff]   ;;  %s4868_s6 = scalar_lea.sflag [#allocation4], %s190_s19  ;;  %s3854_s7 = scalar_lea.vmem %s4856_s30, 32768 }
  0x54   : > { %v3670_v4 = vld [vmem:[%s4078_s17 + $0x200] sm:$0xff]   ;;  %3338 = vmatprep.mubr.msk.bf16.mxu0 %vm1124_vm0, %v3669_v3  ;;  %3600 = vmatprep.subr.msk.bf16.mxu0 %vm1509_vm1, %v3668_v2  ;;  %v3672_v7 = vld [vmem:[%s4078_s17 + $0x208] sm:$0xff]   ;;  %v3674_v9 = vld [vmem:[%s4078_s17 + $0x210] sm:$0xff]   ;;  %p3855_p12 = scmp.ne.s32.totalorder %s4856_s30, %s3854_s7  ;;  %p4925_p1 = scmp.ne.s32.totalorder %s4916_s22, 0 }
  0x55   : > { %3466 = vmatprep.mubr.msk.bf16.mxu1 %vm1124_vm0, %v3670_v4  ;;  %3601 = vmatprep.subr.msk.bf16.mxu1 %vm1509_vm1, %v3668_v2  ;;  %v3675_v10 = vld [vmem:[%s4078_s17 + $0x18] sm:$0xff]   ;;  %v3677_v12 = vld [vmem:[%s4078_s17 + $0x20] sm:$0xff]   ;;  %v3679_v14 = vld [vmem:[%s4078_s17 + $0x28] sm:$0xff]   ;;  %s3930_s26 = smov [#allocation7]  }
  0x56   : > { %v3676_v11 = vld [vmem:[%s4078_s17 + $0x218] sm:$0xff]   ;;  %v3678_v13 = vld [vmem:[%s4078_s17 + $0x220] sm:$0xff]   ;;  %v3680_v15 = vld [vmem:[%s4078_s17 + $0x228] sm:$0xff]   ;;  %p3856_p2 = pnand %p3855_p12, %p4925_p1  ;;  %s3858_s8 = sshll.u32 %s3930_s26, 4  ;;  %s3859_s8 = int_to_ptr.vmem [resolvable:$false] %s3858_s8 }
  0x57   : > { %3337 = vmatpush3.bf16.msra.mxu0 %v1511_v5  ;;  %3599 = vmatpush3.bf16.msra.mxu1 %v1511_v5  ;;  %v3681_v16 = vld [vmem:[%s4078_s17 + $0x30] sm:$0xff]   ;;  %v3683_v18 = vld [vmem:[%s4078_s17 + $0x38] sm:$0xff]   ;;  %v3685_v20 = vld [vmem:[%s4078_s17 + $0x40] sm:$0xff]   ;;  %s3860_s9 = scalar_lea.vmem %s3859_s8, 65536  ;;  %p3861_p4 = scmp.lt.s32.totalorder %s4856_s30, %s3859_s8 }
  0x58   : > { %v3682_v17 = vld [vmem:[%s4078_s17 + $0x230] sm:$0xff]   ;;  %v3684_v19 = vld [vmem:[%s4078_s17 + $0x238] sm:$0xff]   ;;  %v3686_v21 = vld [vmem:[%s4078_s17 + $0x240] sm:$0xff]   ;;  %p3857_p3 = pneg %p3856_p2  ;;  %p3862_p7 = scmp.lt.s32.totalorder %s3860_s9, %s3854_s7 }
  0x59   : > { %v3687_v22 = vld [vmem:[%s4078_s17 + $0x48] sm:$0xff]   ;;  %v3689_v24 = vld [vmem:[%s4078_s17 + $0x50] sm:$0xff]   ;;  %v3691_v26 = vld [vmem:[%s4078_s17 + $0x58] sm:$0xff]  }
  0x5a   : > { %3339 = vmatmul.mubr.msk.bf16.vlgmr.msra.gmra.mrb[0].mxu0 %vm1124_vm0, %v3671_v6  ;;  %3467 = vmatmul.mubr.msk.bf16.vlgmr.msra.gmra.mrb[0].mxu1 %vm1124_vm0, %v3672_v7  ;;  %v3688_v23 = vld [vmem:[%s4078_s17 + $0x248] sm:$0xff]   ;;  %v3690_v25 = vld [vmem:[%s4078_s17 + $0x250] sm:$0xff]   ;;  %v3692_v27 = vld [vmem:[%s4078_s17 + $0x258] sm:$0xff]   ;;  %p3863_p8 = por %p3862_p7, %p3861_p4 }
  0x5b   : > { %3342 = vmatprep.mubr.msk.bf16.mxu0 %vm1124_vm0, %v3673_v8  ;;  %3470 = vmatprep.mubr.msk.bf16.mxu1 %vm1124_vm0, %v3674_v9  ;;  %v3693_v28 = vld [vmem:[%s4078_s17 + $0x60] sm:$0xff]   ;;  %v3695_v30 = vld [vmem:[%s4078_s17 + $0x68] sm:$0xff]   ;;  %v3697_v32 = vld [vmem:[%s4078_s17 + $0x70] sm:$0xff]  }
  0x5c   : > { %v3694_v29 = vld [vmem:[%s4078_s17 + $0x260] sm:$0xff]   ;;  %v3696_v31 = vld [vmem:[%s4078_s17 + $0x268] sm:$0xff]   ;;  %v3698_v33 = vld [vmem:[%s4078_s17 + $0x270] sm:$0xff]   ;;  %p3864_p11 = pnand %p3863_p8, %p3857_p3 }
  0x5d   : > { %v3699_v34 = vld [vmem:[%s4078_s17 + $0x78] sm:$0xff]   ;;  %v3701_v36 = vld [vmem:[%s4078_s17 + $0x80] sm:$0xff]   ;;  %v3703_v38 = vld [vmem:[%s4078_s17 + $0x88] sm:$0xff]  }
  0x5e   : > { %v3700_v35 = vld [vmem:[%s4078_s17 + $0x278] sm:$0xff]   ;;  %v3702_v37 = vld [vmem:[%s4078_s17 + $0x280] sm:$0xff]   ;;  %v3704_v39 = vld [vmem:[%s4078_s17 + $0x288] sm:$0xff]  }
  0x5f   : > { %v3705_v40 = vld [vmem:[%s4078_s17 + $0x90] sm:$0xff]   ;;  %v3707_v42 = vld [vmem:[%s4078_s17 + $0x98] sm:$0xff]   ;;  %v3709_v44 = vld [vmem:[%s4078_s17 + $0xa0] sm:$0xff]  }
  0x60   : > { %v3706_v41 = vld [vmem:[%s4078_s17 + $0x290] sm:$0xff]   ;;  %v3708_v43 = vld [vmem:[%s4078_s17 + $0x298] sm:$0xff]   ;;  %v3710_v45 = vld [vmem:[%s4078_s17 + $0x2a0] sm:$0xff]  }
  0x61   : > { %v3711_v46 = vld [vmem:[%s4078_s17 + $0xa8] sm:$0xff]   ;;  %v3713_v48 = vld [vmem:[%s4078_s17 + $0xb0] sm:$0xff]   ;;  %v3715_v50 = vld [vmem:[%s4078_s17 + $0xb8] sm:$0xff]  }
  0x62   : > { %3343 = vmatmul.mubr.msk.bf16.gmra.mrb[4].mxu0 %vm1124_vm0, %v3675_v10  ;;  %3471 = vmatmul.mubr.msk.bf16.gmra.mrb[4].mxu1 %vm1124_vm0, %v3676_v11  ;;  %v3712_v47 = vld [vmem:[%s4078_s17 + $0x2a8] sm:$0xff]   ;;  %v3714_v49 = vld [vmem:[%s4078_s17 + $0x2b0] sm:$0xff]   ;;  %v3716_v51 = vld [vmem:[%s4078_s17 + $0x2b8] sm:$0xff]  }
  0x63   : > { %3346 = vmatprep.mubr.msk.bf16.mxu0 %vm1124_vm0, %v3677_v12  ;;  %3474 = vmatprep.mubr.msk.bf16.mxu1 %vm1124_vm0, %v3678_v13  ;;  %v3717_v52 = vld [vmem:[%s4078_s17 + $0xc0] sm:$0xff]   ;;  %v3719_v54 = vld [vmem:[%s4078_s17 + $0xc8] sm:$0xff]   ;;  %v3721_v56 = vld [vmem:[%s4078_s17 + $0xd0] sm:$0xff]  }
  0x64   : > { %v3718_v53 = vld [vmem:[%s4078_s17 + $0x2c0] sm:$0xff]   ;;  %v3720_v55 = vld [vmem:[%s4078_s17 + $0x2c8] sm:$0xff]   ;;  %v3722_v57 = vld [vmem:[%s4078_s17 + $0x2d0] sm:$0xff]  }
  0x65   : > { %v3723_v58 = vld [vmem:[%s4078_s17 + $0xd8] sm:$0xff]   ;;  %v3725_v60 = vld [vmem:[%s4078_s17 + $0xe0] sm:$0xff]   ;;  %v3727_v62 = vld [vmem:[%s4078_s17 + $0xe8] sm:$0xff]  }
  0x66   : > { %v3724_v59 = vld [vmem:[%s4078_s17 + $0x2d8] sm:$0xff]   ;;  %v3726_v61 = vld [vmem:[%s4078_s17 + $0x2e0] sm:$0xff]   ;;  %v3728_v63 = vld [vmem:[%s4078_s17 + $0x2e8] sm:$0xff]  }
  0x67   : > { %v3729_v0 = vld [vmem:[%s4078_s17 + $0xf0] sm:$0xff]   ;;  %v3731_v2 = vld [vmem:[%s4078_s17 + $0xf8] sm:$0xff]   ;;  %v3733_v4 = vld [vmem:[%s4078_s17 + $0x100] sm:$0xff]  }
  0x68   : > { %v3730_v1 = vld [vmem:[%s4078_s17 + $0x2f0] sm:$0xff]   ;;  %v3732_v3 = vld [vmem:[%s4078_s17 + $0x2f8] sm:$0xff]   ;;  %v3734_v5 = vld [vmem:[%s4078_s17 + $0x300] sm:$0xff]  }
  0x69   : > { %v3735_v6 = vld [vmem:[%s4078_s17 + $0x108] sm:$0xff]   ;;  %v3737_v8 = vld [vmem:[%s4078_s17 + $0x110] sm:$0xff]   ;;  %v3739_v10 = vld [vmem:[%s4078_s17 + $0x118] sm:$0xff]  }
  0x6a   : > { %3347 = vmatmul.mubr.msk.bf16.gmra.mrb[8].mxu0 %vm1124_vm0, %v3679_v14  ;;  %3475 = vmatmul.mubr.msk.bf16.gmra.mrb[8].mxu1 %vm1124_vm0, %v3680_v15  ;;  %v3736_v7 = vld [vmem:[%s4078_s17 + $0x308] sm:$0xff]   ;;  %v3738_v9 = vld [vmem:[%s4078_s17 + $0x310] sm:$0xff]   ;;  %v3740_v11 = vld [vmem:[%s4078_s17 + $0x318] sm:$0xff]  }
  0x6b   : > { %3350 = vmatprep.mubr.msk.bf16.mxu0 %vm1124_vm0, %v3681_v16  ;;  %3478 = vmatprep.mubr.msk.bf16.mxu1 %vm1124_vm0, %v3682_v17  ;;  %v3741_v12 = vld [vmem:[%s4078_s17 + $0x120] sm:$0xff]   ;;  %v3743_v14 = vld [vmem:[%s4078_s17 + $0x128] sm:$0xff]   ;;  %v3745_v16 = vld [vmem:[%s4078_s17 + $0x130] sm:$0xff]  }
  0x6c   : > { %v3742_v13 = vld [vmem:[%s4078_s17 + $0x320] sm:$0xff]   ;;  %v3744_v15 = vld [vmem:[%s4078_s17 + $0x328] sm:$0xff]   ;;  %v3746_v17 = vld [vmem:[%s4078_s17 + $0x330] sm:$0xff]  }
  0x72   : > { %3351 = vmatmul.mubr.msk.bf16.gmra.mrb[12].mxu0 %vm1124_vm0, %v3683_v18  ;;  %3479 = vmatmul.mubr.msk.bf16.gmra.mrb[12].mxu1 %vm1124_vm0, %v3684_v19  ;;  %v3747_v18 = vld [vmem:[%s4078_s17 + $0x138] sm:$0xff]  }
  0x73   : > { %3354 = vmatprep.mubr.msk.bf16.mxu0 %vm1124_vm0, %v3685_v20  ;;  %3482 = vmatprep.mubr.msk.bf16.mxu1 %vm1124_vm0, %v3686_v21  ;;  %v3748_v19 = vld [vmem:[%s4078_s17 + $0x338] sm:$0xff]   ;;  %v3749_v20 = vld [vmem:[%s4078_s17 + $0x140] sm:$0xff]  }
  0x74   : > { %v3750_v21 = vld [vmem:[%s4078_s17 + $0x340] sm:$0xff]  }
  0x7a   : > { %3355 = vmatmul.mubr.msk.bf16.gmra.mrb[16].mxu0 %vm1124_vm0, %v3687_v22  ;;  %3483 = vmatmul.mubr.msk.bf16.gmra.mrb[16].mxu1 %vm1124_vm0, %v3688_v23  ;;  %v3751_v22 = vld [vmem:[%s4078_s17 + $0x148] sm:$0xff]  }
  0x7b   : > { %3358 = vmatprep.mubr.msk.bf16.mxu0 %vm1124_vm0, %v3689_v24  ;;  %3486 = vmatprep.mubr.msk.bf16.mxu1 %vm1124_vm0, %v3690_v25  ;;  %v3752_v23 = vld [vmem:[%s4078_s17 + $0x348] sm:$0xff]   ;;  %v3753_v24 = vld [vmem:[%s4078_s17 + $0x150] sm:$0xff]  }
  0x7c   : > { %v3754_v25 = vld [vmem:[%s4078_s17 + $0x350] sm:$0xff]  }
  0x82   : > { %3359 = vmatmul.mubr.msk.bf16.gmra.mrb[20].mxu0 %vm1124_vm0, %v3691_v26  ;;  %3487 = vmatmul.mubr.msk.bf16.gmra.mrb[20].mxu1 %vm1124_vm0, %v3692_v27  ;;  %v3755_v26 = vld [vmem:[%s4078_s17 + $0x158] sm:$0xff]  }
  0x83   : > { %3362 = vmatprep.mubr.msk.bf16.mxu0 %vm1124_vm0, %v3693_v28  ;;  %3490 = vmatprep.mubr.msk.bf16.mxu1 %vm1124_vm0, %v3694_v29  ;;  %v3756_v27 = vld [vmem:[%s4078_s17 + $0x358] sm:$0xff]   ;;  %v3757_v28 = vld [vmem:[%s4078_s17 + $0x160] sm:$0xff]  }
  0x84   : > { %v3758_v29 = vld [vmem:[%s4078_s17 + $0x360] sm:$0xff]  }
  0x8a   : > { %3363 = vmatmul.mubr.msk.bf16.gmra.mrb[24].mxu0 %vm1124_vm0, %v3695_v30  ;;  %3491 = vmatmul.mubr.msk.bf16.gmra.mrb[24].mxu1 %vm1124_vm0, %v3696_v31  ;;  %v3759_v30 = vld [vmem:[%s4078_s17 + $0x168] sm:$0xff]  }
  0x8b   : > { %3366 = vmatprep.mubr.msk.bf16.mxu0 %vm1124_vm0, %v3697_v32  ;;  %3494 = vmatprep.mubr.msk.bf16.mxu1 %vm1124_vm0, %v3698_v33  ;;  %v3760_v31 = vld [vmem:[%s4078_s17 + $0x368] sm:$0xff]   ;;  %v3761_v32 = vld [vmem:[%s4078_s17 + $0x170] sm:$0xff]  }
  0x8c   : > { %v3762_v33 = vld [vmem:[%s4078_s17 + $0x370] sm:$0xff]  }
  0x92   : > { %3367 = vmatmul.mubr.msk.bf16.gmra.mrb[28].mxu0 %vm1124_vm0, %v3699_v34  ;;  %3495 = vmatmul.mubr.msk.bf16.gmra.mrb[28].mxu1 %vm1124_vm0, %v3700_v35  ;;  %v3763_v34 = vld [vmem:[%s4078_s17 + $0x178] sm:$0xff]  }
  0x93   : > { %3370 = vmatprep.mubr.msk.bf16.mxu0 %vm1124_vm0, %v3701_v36  ;;  %3498 = vmatprep.mubr.msk.bf16.mxu1 %vm1124_vm0, %v3702_v37  ;;  %v3764_v35 = vld [vmem:[%s4078_s17 + $0x378] sm:$0xff]   ;;  %v3765_v36 = vld [vmem:[%s4078_s17 + $0x180] sm:$0xff]  }
  0x94   : > { %v3766_v37 = vld [vmem:[%s4078_s17 + $0x380] sm:$0xff]  }
  0x9a   : > { %3371 = vmatmul.mubr.msk.bf16.gmra.mrb[32].mxu0 %vm1124_vm0, %v3703_v38  ;;  %3499 = vmatmul.mubr.msk.bf16.gmra.mrb[32].mxu1 %vm1124_vm0, %v3704_v39  ;;  %v3767_v38 = vld [vmem:[%s4078_s17 + $0x188] sm:$0xff]  }
  0x9b   : > { %3374 = vmatprep.mubr.msk.bf16.mxu0 %vm1124_vm0, %v3705_v40  ;;  %3502 = vmatprep.mubr.msk.bf16.mxu1 %vm1124_vm0, %v3706_v41  ;;  %v3768_v39 = vld [vmem:[%s4078_s17 + $0x388] sm:$0xff]   ;;  %v3769_v40 = vld [vmem:[%s4078_s17 + $0x190] sm:$0xff]  }
  0x9c   : > { %v3770_v41 = vld [vmem:[%s4078_s17 + $0x390] sm:$0xff]  }
  0xa2   : > { %3375 = vmatmul.mubr.msk.bf16.gmra.mrb[36].mxu0 %vm1124_vm0, %v3707_v42  ;;  %3503 = vmatmul.mubr.msk.bf16.gmra.mrb[36].mxu1 %vm1124_vm0, %v3708_v43  ;;  %v3771_v42 = vld [vmem:[%s4078_s17 + $0x198] sm:$0xff]  }
  0xa3   : > { %3378 = vmatprep.mubr.msk.bf16.mxu0 %vm1124_vm0, %v3709_v44  ;;  %3506 = vmatprep.mubr.msk.bf16.mxu1 %vm1124_vm0, %v3710_v45  ;;  %v3772_v43 = vld [vmem:[%s4078_s17 + $0x398] sm:$0xff]   ;;  %v3773_v44 = vld [vmem:[%s4078_s17 + $0x1a0] sm:$0xff]  }
  0xa4   : > { %v3774_v45 = vld [vmem:[%s4078_s17 + $0x3a0] sm:$0xff]  }
  0xaa   : > { %3379 = vmatmul.mubr.msk.bf16.gmra.mrb[40].mxu0 %vm1124_vm0, %v3711_v46  ;;  %3507 = vmatmul.mubr.msk.bf16.gmra.mrb[40].mxu1 %vm1124_vm0, %v3712_v47  ;;  %v3775_v46 = vld [vmem:[%s4078_s17 + $0x1a8] sm:$0xff]  }
  0xab   : > { %3382 = vmatprep.mubr.msk.bf16.mxu0 %vm1124_vm0, %v3713_v48  ;;  %3510 = vmatprep.mubr.msk.bf16.mxu1 %vm1124_vm0, %v3714_v49  ;;  %v3776_v47 = vld [vmem:[%s4078_s17 + $0x3a8] sm:$0xff]   ;;  %v3777_v48 = vld [vmem:[%s4078_s17 + $0x1b0] sm:$0xff]  }
  0xac   : > { %v3778_v49 = vld [vmem:[%s4078_s17 + $0x3b0] sm:$0xff]  }
  0xb2   : > { %3383 = vmatmul.mubr.msk.bf16.gmra.mrb[44].mxu0 %vm1124_vm0, %v3715_v50  ;;  %3511 = vmatmul.mubr.msk.bf16.gmra.mrb[44].mxu1 %vm1124_vm0, %v3716_v51  ;;  %v4301_v50 = vld [vmem:[#allocation5] ss:$0 sm:$0xff] }
  0xb3   : > { %3386 = vmatprep.mubr.msk.bf16.mxu0 %vm1124_vm0, %v3717_v52  ;;  %3514 = vmatprep.mubr.msk.bf16.mxu1 %vm1124_vm0, %v3718_v53 }
  0xba   : > { %3387 = vmatmul.mubr.msk.bf16.gmra.mrb[48].mxu0 %vm1124_vm0, %v3719_v54  ;;  %3515 = vmatmul.mubr.msk.bf16.gmra.mrb[48].mxu1 %vm1124_vm0, %v3720_v55 }
  0xbb   : > { %3390 = vmatprep.mubr.msk.bf16.mxu0 %vm1124_vm0, %v3721_v56  ;;  %3518 = vmatprep.mubr.msk.bf16.mxu1 %vm1124_vm0, %v3722_v57  ;;  %v3779_v57 = vld [vmem:[%s4078_s17 + $0x1b8] sm:$0xff]  }
  0xc2   : > { %3391 = vmatmul.mubr.msk.bf16.gmra.mrb[52].mxu0 %vm1124_vm0, %v3723_v58  ;;  %3519 = vmatmul.mubr.msk.bf16.gmra.mrb[52].mxu1 %vm1124_vm0, %v3724_v59  ;;  %v3780_v58 = vld [vmem:[%s4078_s17 + $0x3b8] sm:$0xff]  }
  0xc3   : > { %3394 = vmatprep.mubr.msk.bf16.mxu0 %vm1124_vm0, %v3725_v60  ;;  %3522 = vmatprep.mubr.msk.bf16.mxu1 %vm1124_vm0, %v3726_v61 }
  0xca   : > { %3395 = vmatmul.mubr.msk.bf16.gmra.mrb[56].mxu0 %vm1124_vm0, %v3727_v62  ;;  %3523 = vmatmul.mubr.msk.bf16.gmra.mrb[56].mxu1 %vm1124_vm0, %v3728_v63  ;;  %v3781_v63 = vld [vmem:[%s4078_s17 + $0x1c0] sm:$0xff]  }
  0xcb   : > { %3398 = vmatprep.mubr.msk.bf16.mxu0 %vm1124_vm0, %v3729_v0  ;;  %3526 = vmatprep.mubr.msk.bf16.mxu1 %vm1124_vm0, %v3730_v1  ;;  %v3782_v0 = vld [vmem:[%s4078_s17 + $0x3c0] sm:$0xff]  }
  0xd2   : > { %3399 = vmatmul.mubr.msk.bf16.gmra.mrb[60].mxu0 %vm1124_vm0, %v3731_v2  ;;  %3527 = vmatmul.mubr.msk.bf16.gmra.mrb[60].mxu1 %vm1124_vm0, %v3732_v3 }
  0xd3   : > { %3402 = vmatprep.mubr.msk.bf16.mxu0 %vm1124_vm0, %v3733_v4  ;;  %3530 = vmatprep.mubr.msk.bf16.mxu1 %vm1124_vm0, %v3734_v5 }
  0xda   : > { %3403 = vmatmul.mubr.msk.bf16.gmra.mrb[64].mxu0 %vm1124_vm0, %v3735_v6  ;;  %3531 = vmatmul.mubr.msk.bf16.gmra.mrb[64].mxu1 %vm1124_vm0, %v3736_v7 }
  0xdb   : > { %3406 = vmatprep.mubr.msk.bf16.mxu0 %vm1124_vm0, %v3737_v8  ;;  %3534 = vmatprep.mubr.msk.bf16.mxu1 %vm1124_vm0, %v3738_v9 }
  0xe2   : > { %3407 = vmatmul.mubr.msk.bf16.gmra.mrb[68].mxu0 %vm1124_vm0, %v3739_v10  ;;  %3535 = vmatmul.mubr.msk.bf16.gmra.mrb[68].mxu1 %vm1124_vm0, %v3740_v11 }
  0xe3   : > { %3410 = vmatprep.mubr.msk.bf16.mxu0 %vm1124_vm0, %v3741_v12  ;;  %3538 = vmatprep.mubr.msk.bf16.mxu1 %vm1124_vm0, %v3742_v13  ;;  %v3783_v13 = vld [vmem:[%s4078_s17 + $0x1c8] sm:$0xff]  }
  0xea   : > { %3411 = vmatmul.mubr.msk.bf16.gmra.mrb[72].mxu0 %vm1124_vm0, %v3743_v14  ;;  %3539 = vmatmul.mubr.msk.bf16.gmra.mrb[72].mxu1 %vm1124_vm0, %v3744_v15  ;;  %v3784_v14 = vld [vmem:[%s4078_s17 + $0x3c8] sm:$0xff]  }
  0xeb   : > { %3414 = vmatprep.mubr.msk.bf16.mxu0 %vm1124_vm0, %v3745_v16  ;;  %3542 = vmatprep.mubr.msk.bf16.mxu1 %vm1124_vm0, %v3746_v17 }
  0xf2   : > { %3415 = vmatmul.mubr.msk.bf16.gmra.mrb[76].mxu0 %vm1124_vm0, %v3747_v18  ;;  %3543 = vmatmul.mubr.msk.bf16.gmra.mrb[76].mxu1 %vm1124_vm0, %v3748_v19  ;;  %v3785_v19 = vld [vmem:[%s4078_s17 + $0x1d0] sm:$0xff]  }
  0xf3   : > { %3418 = vmatprep.mubr.msk.bf16.mxu0 %vm1124_vm0, %v3749_v20  ;;  %3546 = vmatprep.mubr.msk.bf16.mxu1 %vm1124_vm0, %v3750_v21  ;;  %v3786_v20 = vld [vmem:[%s4078_s17 + $0x3d0] sm:$0xff]  }
  0xfa   : > { %3419 = vmatmul.mubr.msk.bf16.gmra.mrb[80].mxu0 %vm1124_vm0, %v3751_v22  ;;  %3547 = vmatmul.mubr.msk.bf16.gmra.mrb[80].mxu1 %vm1124_vm0, %v3752_v23 }
  0xfb   : > { %3422 = vmatprep.mubr.msk.bf16.mxu0 %vm1124_vm0, %v3753_v24  ;;  %3550 = vmatprep.mubr.msk.bf16.mxu1 %vm1124_vm0, %v3754_v25 }
 0x102   : > { %3423 = vmatmul.mubr.msk.bf16.gmra.mrb[84].mxu0 %vm1124_vm0, %v3755_v26  ;;  %3551 = vmatmul.mubr.msk.bf16.gmra.mrb[84].mxu1 %vm1124_vm0, %v3756_v27 }
 0x103   : > { %3426 = vmatprep.mubr.msk.bf16.mxu0 %vm1124_vm0, %v3757_v28  ;;  %3554 = vmatprep.mubr.msk.bf16.mxu1 %vm1124_vm0, %v3758_v29 }
 0x10a   : > { %3427 = vmatmul.mubr.msk.bf16.gmra.mrb[88].mxu0 %vm1124_vm0, %v3759_v30  ;;  %3555 = vmatmul.mubr.msk.bf16.gmra.mrb[88].mxu1 %vm1124_vm0, %v3760_v31 }
 0x10b   : > { %3430 = vmatprep.mubr.msk.bf16.mxu0 %vm1124_vm0, %v3761_v32  ;;  %3558 = vmatprep.mubr.msk.bf16.mxu1 %vm1124_vm0, %v3762_v33  ;;  %v3787_v33 = vld [vmem:[%s4078_s17 + $0x1d8] sm:$0xff]  }
 0x112   : > { %3431 = vmatmul.mubr.msk.bf16.gmra.mrb[92].mxu0 %vm1124_vm0, %v3763_v34  ;;  %3559 = vmatmul.mubr.msk.bf16.gmra.mrb[92].mxu1 %vm1124_vm0, %v3764_v35  ;;  %v3788_v34 = vld [vmem:[%s4078_s17 + $0x3d8] sm:$0xff]  }
 0x113   : > { %3434 = vmatprep.mubr.msk.bf16.mxu0 %vm1124_vm0, %v3765_v36  ;;  %3562 = vmatprep.mubr.msk.bf16.mxu1 %vm1124_vm0, %v3766_v37 }
 0x11a   : > { %3435 = vmatmul.mubr.msk.bf16.gmra.mrb[96].mxu0 %vm1124_vm0, %v3767_v38  ;;  %3563 = vmatmul.mubr.msk.bf16.gmra.mrb[96].mxu1 %vm1124_vm0, %v3768_v39  ;;  %v3789_v39 = vld [vmem:[%s4078_s17 + $0x1e0] sm:$0xff]  }
 0x11b   : > { %3438 = vmatprep.mubr.msk.bf16.mxu0 %vm1124_vm0, %v3769_v40  ;;  %3566 = vmatprep.mubr.msk.bf16.mxu1 %vm1124_vm0, %v3770_v41  ;;  %v3790_v40 = vld [vmem:[%s4078_s17 + $0x3e0] sm:$0xff]  }
 0x122   : > { %3439 = vmatmul.mubr.msk.bf16.gmra.mrb[100].mxu0 %vm1124_vm0, %v3771_v42  ;;  %3567 = vmatmul.mubr.msk.bf16.gmra.mrb[100].mxu1 %vm1124_vm0, %v3772_v43 }
 0x123   : > { %3442 = vmatprep.mubr.msk.bf16.mxu0 %vm1124_vm0, %v3773_v44  ;;  %3570 = vmatprep.mubr.msk.bf16.mxu1 %vm1124_vm0, %v3774_v45 }
 0x12a   : > { %3443 = vmatmul.mubr.msk.bf16.gmra.mrb[104].mxu0 %vm1124_vm0, %v3775_v46  ;;  %3571 = vmatmul.mubr.msk.bf16.gmra.mrb[104].mxu1 %vm1124_vm0, %v3776_v47 }
 0x12b   : > { %3446 = vmatprep.mubr.msk.bf16.mxu0 %vm1124_vm0, %v3777_v48  ;;  %3574 = vmatprep.mubr.msk.bf16.mxu1 %vm1124_vm0, %v3778_v49 }
 0x12d   : > { %v3340_v51 = vpop.f32.mrb[0].mxu0  ;;  %v3468_v52 = vpop.f32.mrb[0].mxu1 }
 0x12e   : > { %v1556_v53 = vadd.f32 %v3340_v51, %v4301_v50  ;;  %v2068_v54 = vadd.f32 %v3468_v52, %v4301_v50  ;;  %v1547_v55 = vpop.f32.mrb[1].mxu0  ;;  %v2059_v56 = vpop.f32.mrb[1].mxu1 }
 0x12f   : > { %v1548_v59 = vadd.f32 %v4301_v50, %v1547_v55  ;;  %v2060_v60 = vadd.f32 %v4301_v50, %v2059_v56  ;;  %v3341_v61 = vpop.f32.mrb[2].mxu0  ;;  %v3469_v62 = vpop.f32.mrb[2].mxu1  ;;  %v3792_v55 = vld [vmem:[%s4078_s17 + $0x3e8] sm:$0xff]  }
 0x130   : > { %2572 = vst [vmem:[%s4313_s25 + $0x10] sm:$0xff] %v1556_v53  ;;  %2700 = vst [vmem:[%s4313_s25 + $0x410] sm:$0xff] %v2068_v54  ;;  %v1559_v1 = vadd.f32 %v3341_v61, %v4301_v50  ;;  %v2071_v2 = vadd.f32 %v3469_v62, %v4301_v50  ;;  %v1550_v3 = vpop.f32.mrb[3].mxu0  ;;  %v2062_v4 = vpop.f32.mrb[3].mxu1  ;;  %v3791_v54 = vld [vmem:[%s4078_s17 + $0x1e8] sm:$0xff]   ;;  %v3794_v61 = vld [vmem:[%s4078_s17 + $0x3f0] sm:$0xff]  }
 0x131   : > { %2570 = vst [vmem:[%s4313_s25] sm:$0xff] %v1548_v59  ;;  %2698 = vst [vmem:[%s4313_s25 + $0x400] sm:$0xff] %v2060_v60  ;;  %v1551_v5 = vadd.f32 %v4301_v50, %v1550_v3  ;;  %v2063_v6 = vadd.f32 %v4301_v50, %v2062_v4  ;;  %v3793_v60 = vld [vmem:[%s4078_s17 + $0x1f0] sm:$0xff]  }
 0x132   : > { %2573 = vst [vmem:[%s4313_s25 + $0x18] sm:$0xff] %v1559_v1  ;;  %2701 = vst [vmem:[%s4313_s25 + $0x418] sm:$0xff] %v2071_v2  ;;  %3447 = vmatmul.mubr.msk.bf16.gmra.mrb[108].mxu0 %vm1124_vm0, %v3779_v57  ;;  %3575 = vmatmul.mubr.msk.bf16.gmra.mrb[108].mxu1 %vm1124_vm0, %v3780_v58 }
 0x133   : > { %2571 = vst [vmem:[%s4313_s25 + $0x8] sm:$0xff] %v1551_v5  ;;  %2699 = vst [vmem:[%s4313_s25 + $0x408] sm:$0xff] %v2063_v6  ;;  %3450 = vmatprep.mubr.msk.bf16.mxu0 %vm1124_vm0, %v3781_v63  ;;  %3578 = vmatprep.mubr.msk.bf16.mxu1 %vm1124_vm0, %v3782_v0 }
 0x135   : > { %v3344_v7 = vpop.f32.mrb[4].mxu0  ;;  %v3472_v8 = vpop.f32.mrb[4].mxu1 }
 0x136   : > { %v1572_v9 = vadd.f32 %v3344_v7, %v4301_v50  ;;  %v2084_v10 = vadd.f32 %v3472_v8, %v4301_v50  ;;  %v1563_v11 = vpop.f32.mrb[5].mxu0  ;;  %v2075_v12 = vpop.f32.mrb[5].mxu1 }
 0x137   : > { %v1564_v15 = vadd.f32 %v4301_v50, %v1563_v11  ;;  %v2076_v16 = vadd.f32 %v4301_v50, %v2075_v12  ;;  %v3345_v17 = vpop.f32.mrb[6].mxu0  ;;  %v3473_v18 = vpop.f32.mrb[6].mxu1  ;;  %v3796_v11 = vld [vmem:[%s4078_s17 + $0x3f8] sm:$0xff]  }
 0x138   : > { %2576 = vst [vmem:[%s4313_s25 + $0x30] sm:$0xff] %v1572_v9  ;;  %2704 = vst [vmem:[%s4313_s25 + $0x430] sm:$0xff] %v2084_v10  ;;  %v1575_v21 = vadd.f32 %v3345_v17, %v4301_v50  ;;  %v2087_v22 = vadd.f32 %v3473_v18, %v4301_v50  ;;  %v1566_v23 = vpop.f32.mrb[7].mxu0  ;;  %v2078_v24 = vpop.f32.mrb[7].mxu1  ;;  %v3795_v10 = vld [vmem:[%s4078_s17 + $0x1f8] sm:$0xff]  }
 0x139   : > { %2574 = vst [vmem:[%s4313_s25 + $0x20] sm:$0xff] %v1564_v15  ;;  %2702 = vst [vmem:[%s4313_s25 + $0x420] sm:$0xff] %v2076_v16  ;;  %v1567_v25 = vadd.f32 %v4301_v50, %v1566_v23  ;;  %v2079_v26 = vadd.f32 %v4301_v50, %v2078_v24 }
 0x13a   : > { %2577 = vst [vmem:[%s4313_s25 + $0x38] sm:$0xff] %v1575_v21  ;;  %2705 = vst [vmem:[%s4313_s25 + $0x438] sm:$0xff] %v2087_v22  ;;  %3451 = vmatmul.mubr.msk.bf16.gmra.mrb[112].mxu0 %vm1124_vm0, %v3783_v13  ;;  %3579 = vmatmul.mubr.msk.bf16.gmra.mrb[112].mxu1 %vm1124_vm0, %v3784_v14 }
 0x13b   : > { %2575 = vst [vmem:[%s4313_s25 + $0x28] sm:$0xff] %v1567_v25  ;;  %2703 = vst [vmem:[%s4313_s25 + $0x428] sm:$0xff] %v2079_v26  ;;  %3454 = vmatprep.mubr.msk.bf16.mxu0 %vm1124_vm0, %v3785_v19  ;;  %3582 = vmatprep.mubr.msk.bf16.mxu1 %vm1124_vm0, %v3786_v20 }
 0x13d   : > { %v3348_v27 = vpop.f32.mrb[8].mxu0  ;;  %v3476_v28 = vpop.f32.mrb[8].mxu1 }
 0x13e   : > { %v1588_v29 = vadd.f32 %v3348_v27, %v4301_v50  ;;  %v2100_v30 = vadd.f32 %v3476_v28, %v4301_v50  ;;  %v1579_v31 = vpop.f32.mrb[9].mxu0  ;;  %v2091_v32 = vpop.f32.mrb[9].mxu1 }
 0x13f   : > { %v1580_v35 = vadd.f32 %v4301_v50, %v1579_v31  ;;  %v2092_v36 = vadd.f32 %v4301_v50, %v2091_v32  ;;  %v3349_v37 = vpop.f32.mrb[10].mxu0  ;;  %v3477_v38 = vpop.f32.mrb[10].mxu1 }
 0x140   : > { %2580 = vst [vmem:[%s4313_s25 + $0x50] sm:$0xff] %v1588_v29  ;;  %2708 = vst [vmem:[%s4313_s25 + $0x450] sm:$0xff] %v2100_v30  ;;  %v1591_v41 = vadd.f32 %v3349_v37, %v4301_v50  ;;  %v2103_v42 = vadd.f32 %v3477_v38, %v4301_v50  ;;  %v1582_v43 = vpop.f32.mrb[11].mxu0  ;;  %v2094_v44 = vpop.f32.mrb[11].mxu1 }
 0x141   : > { %2578 = vst [vmem:[%s4313_s25 + $0x40] sm:$0xff] %v1580_v35  ;;  %2706 = vst [vmem:[%s4313_s25 + $0x440] sm:$0xff] %v2092_v36  ;;  %v1583_v45 = vadd.f32 %v4301_v50, %v1582_v43  ;;  %v2095_v46 = vadd.f32 %v4301_v50, %v2094_v44 }
 0x142   : > { %2581 = vst [vmem:[%s4313_s25 + $0x58] sm:$0xff] %v1591_v41  ;;  %2709 = vst [vmem:[%s4313_s25 + $0x458] sm:$0xff] %v2103_v42  ;;  %3455 = vmatmul.mubr.msk.bf16.gmra.mrb[116].mxu0 %vm1124_vm0, %v3787_v33  ;;  %3583 = vmatmul.mubr.msk.bf16.gmra.mrb[116].mxu1 %vm1124_vm0, %v3788_v34 }
 0x143   : > { %2579 = vst [vmem:[%s4313_s25 + $0x48] sm:$0xff] %v1583_v45  ;;  %2707 = vst [vmem:[%s4313_s25 + $0x448] sm:$0xff] %v2095_v46  ;;  %3458 = vmatprep.mubr.msk.bf16.mxu0 %vm1124_vm0, %v3789_v39  ;;  %3586 = vmatprep.mubr.msk.bf16.mxu1 %vm1124_vm0, %v3790_v40 }
 0x145   : > { %v3352_v47 = vpop.f32.mrb[12].mxu0  ;;  %v3480_v48 = vpop.f32.mrb[12].mxu1 }
 0x146   : > { %v1604_v49 = vadd.f32 %v3352_v47, %v4301_v50  ;;  %v2116_v51 = vadd.f32 %v3480_v48, %v4301_v50  ;;  %v1595_v52 = vpop.f32.mrb[13].mxu0  ;;  %v2107_v53 = vpop.f32.mrb[13].mxu1 }
 0x147   : > { %v1596_v56 = vadd.f32 %v4301_v50, %v1595_v52  ;;  %v2108_v57 = vadd.f32 %v4301_v50, %v2107_v53  ;;  %v3353_v58 = vpop.f32.mrb[14].mxu0  ;;  %v3481_v59 = vpop.f32.mrb[14].mxu1 }
 0x148   : > { %2584 = vst [vmem:[%s4313_s25 + $0x70] sm:$0xff] %v1604_v49  ;;  %2712 = vst [vmem:[%s4313_s25 + $0x470] sm:$0xff] %v2116_v51  ;;  %v1607_v62 = vadd.f32 %v3353_v58, %v4301_v50  ;;  %v2119_v63 = vadd.f32 %v3481_v59, %v4301_v50  ;;  %v1598_v0 = vpop.f32.mrb[15].mxu0  ;;  %v2110_v1 = vpop.f32.mrb[15].mxu1 }
 0x149   : > { %2582 = vst [vmem:[%s4313_s25 + $0x60] sm:$0xff] %v1596_v56  ;;  %2710 = vst [vmem:[%s4313_s25 + $0x460] sm:$0xff] %v2108_v57  ;;  %v1599_v2 = vadd.f32 %v4301_v50, %v1598_v0  ;;  %v2111_v3 = vadd.f32 %v4301_v50, %v2110_v1 }
 0x14a   : > { %2585 = vst [vmem:[%s4313_s25 + $0x78] sm:$0xff] %v1607_v62  ;;  %2713 = vst [vmem:[%s4313_s25 + $0x478] sm:$0xff] %v2119_v63  ;;  %3459 = vmatmul.mubr.msk.bf16.gmra.mrb[120].mxu0 %vm1124_vm0, %v3791_v54  ;;  %3587 = vmatmul.mubr.msk.bf16.gmra.mrb[120].mxu1 %vm1124_vm0, %v3792_v55 }
 0x14b   : > { %2583 = vst [vmem:[%s4313_s25 + $0x68] sm:$0xff] %v1599_v2  ;;  %2711 = vst [vmem:[%s4313_s25 + $0x468] sm:$0xff] %v2111_v3  ;;  %3462 = vmatprep.mubr.msk.bf16.mxu0 %vm1124_vm0, %v3793_v60  ;;  %3590 = vmatprep.mubr.msk.bf16.mxu1 %vm1124_vm0, %v3794_v61 }
 0x14d   : > { %v3356_v4 = vpop.f32.mrb[16].mxu0  ;;  %v3484_v5 = vpop.f32.mrb[16].mxu1 }
 0x14e   : > { %v1620_v6 = vadd.f32 %v3356_v4, %v4301_v50  ;;  %v2132_v7 = vadd.f32 %v3484_v5, %v4301_v50  ;;  %v1611_v8 = vpop.f32.mrb[17].mxu0  ;;  %v2123_v9 = vpop.f32.mrb[17].mxu1 }
 0x14f   : > { %v1612_v12 = vadd.f32 %v4301_v50, %v1611_v8  ;;  %v2124_v13 = vadd.f32 %v4301_v50, %v2123_v9  ;;  %v3357_v14 = vpop.f32.mrb[18].mxu0  ;;  %v3485_v15 = vpop.f32.mrb[18].mxu1 }
 0x150   : > { %2588 = vst [vmem:[%s4313_s25 + $0x90] sm:$0xff] %v1620_v6  ;;  %2716 = vst [vmem:[%s4313_s25 + $0x490] sm:$0xff] %v2132_v7  ;;  %v1623_v16 = vadd.f32 %v3357_v14, %v4301_v50  ;;  %v2135_v17 = vadd.f32 %v3485_v15, %v4301_v50  ;;  %v1614_v18 = vpop.f32.mrb[19].mxu0  ;;  %v2126_v19 = vpop.f32.mrb[19].mxu1 }
 0x151   : > { %2586 = vst [vmem:[%s4313_s25 + $0x80] sm:$0xff] %v1612_v12  ;;  %2714 = vst [vmem:[%s4313_s25 + $0x480] sm:$0xff] %v2124_v13  ;;  %v1615_v20 = vadd.f32 %v4301_v50, %v1614_v18  ;;  %v2127_v21 = vadd.f32 %v4301_v50, %v2126_v19 }
 0x152   : > { %2589 = vst [vmem:[%s4313_s25 + $0x98] sm:$0xff] %v1623_v16  ;;  %2717 = vst [vmem:[%s4313_s25 + $0x498] sm:$0xff] %v2135_v17  ;;  %3463 = vmatmul.mubr.msk.bf16.gmra.mrb[124].mxu0 %vm1124_vm0, %v3795_v10  ;;  %3591 = vmatmul.mubr.msk.bf16.gmra.mrb[124].mxu1 %vm1124_vm0, %v3796_v11 }
 0x153   : > { %2587 = vst [vmem:[%s4313_s25 + $0x88] sm:$0xff] %v1615_v20  ;;  %2715 = vst [vmem:[%s4313_s25 + $0x488] sm:$0xff] %v2127_v21 }
 0x155   : > { %v3360_v22 = vpop.f32.mrb[20].mxu0  ;;  %v3488_v23 = vpop.f32.mrb[20].mxu1 }
 0x156   : > { %v1636_v24 = vadd.f32 %v3360_v22, %v4301_v50  ;;  %v2148_v25 = vadd.f32 %v3488_v23, %v4301_v50  ;;  %v1627_v26 = vpop.f32.mrb[21].mxu0  ;;  %v2139_v27 = vpop.f32.mrb[21].mxu1 }
 0x157   : > { %v1628_v28 = vadd.f32 %v4301_v50, %v1627_v26  ;;  %v2140_v29 = vadd.f32 %v4301_v50, %v2139_v27  ;;  %v3361_v30 = vpop.f32.mrb[22].mxu0  ;;  %v3489_v31 = vpop.f32.mrb[22].mxu1 }
 0x158   : > { %2592 = vst [vmem:[%s4313_s25 + $0xb0] sm:$0xff] %v1636_v24  ;;  %2720 = vst [vmem:[%s4313_s25 + $0x4b0] sm:$0xff] %v2148_v25  ;;  %v1639_v32 = vadd.f32 %v3361_v30, %v4301_v50  ;;  %v2151_v33 = vadd.f32 %v3489_v31, %v4301_v50  ;;  %v1630_v34 = vpop.f32.mrb[23].mxu0  ;;  %v2142_v35 = vpop.f32.mrb[23].mxu1 }
 0x159   : > { %2590 = vst [vmem:[%s4313_s25 + $0xa0] sm:$0xff] %v1628_v28  ;;  %2718 = vst [vmem:[%s4313_s25 + $0x4a0] sm:$0xff] %v2140_v29  ;;  %v1631_v36 = vadd.f32 %v4301_v50, %v1630_v34  ;;  %v2143_v37 = vadd.f32 %v4301_v50, %v2142_v35 }
 0x15a   : > { %2593 = vst [vmem:[%s4313_s25 + $0xb8] sm:$0xff] %v1639_v32  ;;  %2721 = vst [vmem:[%s4313_s25 + $0x4b8] sm:$0xff] %v2151_v33 }
 0x15b   : > { %2591 = vst [vmem:[%s4313_s25 + $0xa8] sm:$0xff] %v1631_v36  ;;  %2719 = vst [vmem:[%s4313_s25 + $0x4a8] sm:$0xff] %v2143_v37 }
 0x15d   : > { %v3364_v38 = vpop.f32.mrb[24].mxu0  ;;  %v3492_v39 = vpop.f32.mrb[24].mxu1 }
 0x15e   : > { %v1652_v40 = vadd.f32 %v3364_v38, %v4301_v50  ;;  %v2164_v41 = vadd.f32 %v3492_v39, %v4301_v50  ;;  %v1643_v42 = vpop.f32.mrb[25].mxu0  ;;  %v2155_v43 = vpop.f32.mrb[25].mxu1 }
 0x15f   : > { %v1644_v44 = vadd.f32 %v4301_v50, %v1643_v42  ;;  %v2156_v45 = vadd.f32 %v4301_v50, %v2155_v43  ;;  %v3365_v46 = vpop.f32.mrb[26].mxu0  ;;  %v3493_v47 = vpop.f32.mrb[26].mxu1 }
 0x160   : > { %2596 = vst [vmem:[%s4313_s25 + $0xd0] sm:$0xff] %v1652_v40  ;;  %2724 = vst [vmem:[%s4313_s25 + $0x4d0] sm:$0xff] %v2164_v41  ;;  %v1655_v48 = vadd.f32 %v3365_v46, %v4301_v50  ;;  %v2167_v49 = vadd.f32 %v3493_v47, %v4301_v50  ;;  %v1646_v51 = vpop.f32.mrb[27].mxu0  ;;  %v2158_v52 = vpop.f32.mrb[27].mxu1 }
 0x161   : > { %2594 = vst [vmem:[%s4313_s25 + $0xc0] sm:$0xff] %v1644_v44  ;;  %2722 = vst [vmem:[%s4313_s25 + $0x4c0] sm:$0xff] %v2156_v45  ;;  %v1647_v53 = vadd.f32 %v4301_v50, %v1646_v51  ;;  %v2159_v54 = vadd.f32 %v4301_v50, %v2158_v52 }
 0x162   : > { %2597 = vst [vmem:[%s4313_s25 + $0xd8] sm:$0xff] %v1655_v48  ;;  %2725 = vst [vmem:[%s4313_s25 + $0x4d8] sm:$0xff] %v2167_v49 }
 0x163   : > { %2595 = vst [vmem:[%s4313_s25 + $0xc8] sm:$0xff] %v1647_v53  ;;  %2723 = vst [vmem:[%s4313_s25 + $0x4c8] sm:$0xff] %v2159_v54 }
 0x165   : > { %v3368_v55 = vpop.f32.mrb[28].mxu0  ;;  %v3496_v56 = vpop.f32.mrb[28].mxu1 }
 0x166   : > { %v1668_v57 = vadd.f32 %v3368_v55, %v4301_v50  ;;  %v2180_v58 = vadd.f32 %v3496_v56, %v4301_v50  ;;  %v1659_v59 = vpop.f32.mrb[29].mxu0  ;;  %v2171_v60 = vpop.f32.mrb[29].mxu1 }
 0x167   : > { %v1660_v61 = vadd.f32 %v4301_v50, %v1659_v59  ;;  %v2172_v62 = vadd.f32 %v4301_v50, %v2171_v60  ;;  %v3369_v63 = vpop.f32.mrb[30].mxu0  ;;  %v3497_v0 = vpop.f32.mrb[30].mxu1 }
 0x168   : > { %2600 = vst [vmem:[%s4313_s25 + $0xf0] sm:$0xff] %v1668_v57  ;;  %2728 = vst [vmem:[%s4313_s25 + $0x4f0] sm:$0xff] %v2180_v58  ;;  %v1671_v1 = vadd.f32 %v3369_v63, %v4301_v50  ;;  %v2183_v2 = vadd.f32 %v3497_v0, %v4301_v50  ;;  %v1662_v3 = vpop.f32.mrb[31].mxu0  ;;  %v2174_v4 = vpop.f32.mrb[31].mxu1 }
 0x169   : > { %2598 = vst [vmem:[%s4313_s25 + $0xe0] sm:$0xff] %v1660_v61  ;;  %2726 = vst [vmem:[%s4313_s25 + $0x4e0] sm:$0xff] %v2172_v62  ;;  %v1663_v5 = vadd.f32 %v4301_v50, %v1662_v3  ;;  %v2175_v6 = vadd.f32 %v4301_v50, %v2174_v4 }
 0x16a   : > { %2601 = vst [vmem:[%s4313_s25 + $0xf8] sm:$0xff] %v1671_v1  ;;  %2729 = vst [vmem:[%s4313_s25 + $0x4f8] sm:$0xff] %v2183_v2 }
 0x16b   : > { %2599 = vst [vmem:[%s4313_s25 + $0xe8] sm:$0xff] %v1663_v5  ;;  %2727 = vst [vmem:[%s4313_s25 + $0x4e8] sm:$0xff] %v2175_v6 }
 0x16d   : > { %v3372_v7 = vpop.f32.mrb[32].mxu0  ;;  %v3500_v8 = vpop.f32.mrb[32].mxu1 }
 0x16e   : > { %v1684_v9 = vadd.f32 %v3372_v7, %v4301_v50  ;;  %v2196_v10 = vadd.f32 %v3500_v8, %v4301_v50  ;;  %v1675_v11 = vpop.f32.mrb[33].mxu0  ;;  %v2187_v12 = vpop.f32.mrb[33].mxu1 }
 0x16f   : > { %v1676_v13 = vadd.f32 %v4301_v50, %v1675_v11  ;;  %v2188_v14 = vadd.f32 %v4301_v50, %v2187_v12  ;;  %v3373_v15 = vpop.f32.mrb[34].mxu0  ;;  %v3501_v16 = vpop.f32.mrb[34].mxu1 }
 0x170   : > { %2604 = vst [vmem:[%s4313_s25 + $0x110] sm:$0xff] %v1684_v9  ;;  %2732 = vst [vmem:[%s4313_s25 + $0x510] sm:$0xff] %v2196_v10  ;;  %v1687_v17 = vadd.f32 %v3373_v15, %v4301_v50  ;;  %v2199_v18 = vadd.f32 %v3501_v16, %v4301_v50  ;;  %v1678_v19 = vpop.f32.mrb[35].mxu0  ;;  %v2190_v20 = vpop.f32.mrb[35].mxu1 }
 0x171   : > { %2602 = vst [vmem:[%s4313_s25 + $0x100] sm:$0xff] %v1676_v13  ;;  %2730 = vst [vmem:[%s4313_s25 + $0x500] sm:$0xff] %v2188_v14  ;;  %v1679_v21 = vadd.f32 %v4301_v50, %v1678_v19  ;;  %v2191_v22 = vadd.f32 %v4301_v50, %v2190_v20 }
 0x172   : > { %2605 = vst [vmem:[%s4313_s25 + $0x118] sm:$0xff] %v1687_v17  ;;  %2733 = vst [vmem:[%s4313_s25 + $0x518] sm:$0xff] %v2199_v18 }
 0x173   : > { %2603 = vst [vmem:[%s4313_s25 + $0x108] sm:$0xff] %v1679_v21  ;;  %2731 = vst [vmem:[%s4313_s25 + $0x508] sm:$0xff] %v2191_v22 }
 0x175   : > { %v3376_v23 = vpop.f32.mrb[36].mxu0  ;;  %v3504_v24 = vpop.f32.mrb[36].mxu1 }
 0x176   : > { %v1700_v25 = vadd.f32 %v3376_v23, %v4301_v50  ;;  %v2212_v26 = vadd.f32 %v3504_v24, %v4301_v50  ;;  %v1691_v27 = vpop.f32.mrb[37].mxu0  ;;  %v2203_v28 = vpop.f32.mrb[37].mxu1 }
 0x177   : > { %v1692_v29 = vadd.f32 %v4301_v50, %v1691_v27  ;;  %v2204_v30 = vadd.f32 %v4301_v50, %v2203_v28  ;;  %v3377_v31 = vpop.f32.mrb[38].mxu0  ;;  %v3505_v32 = vpop.f32.mrb[38].mxu1 }
 0x178   : > { %2608 = vst [vmem:[%s4313_s25 + $0x130] sm:$0xff] %v1700_v25  ;;  %2736 = vst [vmem:[%s4313_s25 + $0x530] sm:$0xff] %v2212_v26  ;;  %v1703_v33 = vadd.f32 %v3377_v31, %v4301_v50  ;;  %v2215_v34 = vadd.f32 %v3505_v32, %v4301_v50  ;;  %v1694_v35 = vpop.f32.mrb[39].mxu0  ;;  %v2206_v36 = vpop.f32.mrb[39].mxu1 }
 0x179   : > { %2606 = vst [vmem:[%s4313_s25 + $0x120] sm:$0xff] %v1692_v29  ;;  %2734 = vst [vmem:[%s4313_s25 + $0x520] sm:$0xff] %v2204_v30  ;;  %v1695_v37 = vadd.f32 %v4301_v50, %v1694_v35  ;;  %v2207_v38 = vadd.f32 %v4301_v50, %v2206_v36 }
 0x17a   : > { %2609 = vst [vmem:[%s4313_s25 + $0x138] sm:$0xff] %v1703_v33  ;;  %2737 = vst [vmem:[%s4313_s25 + $0x538] sm:$0xff] %v2215_v34 }
 0x17b   : > { %2607 = vst [vmem:[%s4313_s25 + $0x128] sm:$0xff] %v1695_v37  ;;  %2735 = vst [vmem:[%s4313_s25 + $0x528] sm:$0xff] %v2207_v38 }
 0x17d   : > { %v3380_v39 = vpop.f32.mrb[40].mxu0  ;;  %v3508_v40 = vpop.f32.mrb[40].mxu1 }
 0x17e   : > { %v1716_v41 = vadd.f32 %v3380_v39, %v4301_v50  ;;  %v2228_v42 = vadd.f32 %v3508_v40, %v4301_v50  ;;  %v1707_v43 = vpop.f32.mrb[41].mxu0  ;;  %v2219_v44 = vpop.f32.mrb[41].mxu1 }
 0x17f   : > { %v1708_v45 = vadd.f32 %v4301_v50, %v1707_v43  ;;  %v2220_v46 = vadd.f32 %v4301_v50, %v2219_v44  ;;  %v3381_v47 = vpop.f32.mrb[42].mxu0  ;;  %v3509_v48 = vpop.f32.mrb[42].mxu1 }
 0x180   : > { %2612 = vst [vmem:[%s4313_s25 + $0x150] sm:$0xff] %v1716_v41  ;;  %2740 = vst [vmem:[%s4313_s25 + $0x550] sm:$0xff] %v2228_v42  ;;  %v1719_v49 = vadd.f32 %v3381_v47, %v4301_v50  ;;  %v2231_v51 = vadd.f32 %v3509_v48, %v4301_v50  ;;  %v1710_v52 = vpop.f32.mrb[43].mxu0  ;;  %v2222_v53 = vpop.f32.mrb[43].mxu1 }
 0x181   : > { %2610 = vst [vmem:[%s4313_s25 + $0x140] sm:$0xff] %v1708_v45  ;;  %2738 = vst [vmem:[%s4313_s25 + $0x540] sm:$0xff] %v2220_v46  ;;  %v1711_v54 = vadd.f32 %v4301_v50, %v1710_v52  ;;  %v2223_v55 = vadd.f32 %v4301_v50, %v2222_v53 }
 0x182   : > { %2613 = vst [vmem:[%s4313_s25 + $0x158] sm:$0xff] %v1719_v49  ;;  %2741 = vst [vmem:[%s4313_s25 + $0x558] sm:$0xff] %v2231_v51 }
 0x183   : > { %2611 = vst [vmem:[%s4313_s25 + $0x148] sm:$0xff] %v1711_v54  ;;  %2739 = vst [vmem:[%s4313_s25 + $0x548] sm:$0xff] %v2223_v55 }
 0x185   : > { %v3384_v56 = vpop.f32.mrb[44].mxu0  ;;  %v3512_v57 = vpop.f32.mrb[44].mxu1 }
 0x186   : > { %v1732_v58 = vadd.f32 %v3384_v56, %v4301_v50  ;;  %v2244_v59 = vadd.f32 %v3512_v57, %v4301_v50  ;;  %v1723_v60 = vpop.f32.mrb[45].mxu0  ;;  %v2235_v61 = vpop.f32.mrb[45].mxu1 }
 0x187   : > { %v1724_v62 = vadd.f32 %v4301_v50, %v1723_v60  ;;  %v2236_v63 = vadd.f32 %v4301_v50, %v2235_v61  ;;  %v3385_v0 = vpop.f32.mrb[46].mxu0  ;;  %v3513_v1 = vpop.f32.mrb[46].mxu1 }
 0x188   : > { %2616 = vst [vmem:[%s4313_s25 + $0x170] sm:$0xff] %v1732_v58  ;;  %2744 = vst [vmem:[%s4313_s25 + $0x570] sm:$0xff] %v2244_v59  ;;  %v1735_v2 = vadd.f32 %v3385_v0, %v4301_v50  ;;  %v2247_v3 = vadd.f32 %v3513_v1, %v4301_v50  ;;  %v1726_v4 = vpop.f32.mrb[47].mxu0  ;;  %v2238_v5 = vpop.f32.mrb[47].mxu1 }
 0x189   : > { %2614 = vst [vmem:[%s4313_s25 + $0x160] sm:$0xff] %v1724_v62  ;;  %2742 = vst [vmem:[%s4313_s25 + $0x560] sm:$0xff] %v2236_v63  ;;  %v1727_v6 = vadd.f32 %v4301_v50, %v1726_v4  ;;  %v2239_v7 = vadd.f32 %v4301_v50, %v2238_v5 }
 0x18a   : > { %2617 = vst [vmem:[%s4313_s25 + $0x178] sm:$0xff] %v1735_v2  ;;  %2745 = vst [vmem:[%s4313_s25 + $0x578] sm:$0xff] %v2247_v3 }
 0x18b   : > { %2615 = vst [vmem:[%s4313_s25 + $0x168] sm:$0xff] %v1727_v6  ;;  %2743 = vst [vmem:[%s4313_s25 + $0x568] sm:$0xff] %v2239_v7 }
 0x18d   : > { %v3388_v8 = vpop.f32.mrb[48].mxu0  ;;  %v3516_v9 = vpop.f32.mrb[48].mxu1 }
 0x18e   : > { %v1748_v10 = vadd.f32 %v3388_v8, %v4301_v50  ;;  %v2260_v11 = vadd.f32 %v3516_v9, %v4301_v50  ;;  %v1739_v12 = vpop.f32.mrb[49].mxu0  ;;  %v2251_v13 = vpop.f32.mrb[49].mxu1 }
 0x18f   : > { %v1740_v14 = vadd.f32 %v4301_v50, %v1739_v12  ;;  %v2252_v15 = vadd.f32 %v4301_v50, %v2251_v13  ;;  %v3389_v16 = vpop.f32.mrb[50].mxu0  ;;  %v3517_v17 = vpop.f32.mrb[50].mxu1 }
 0x190   : > { %2620 = vst [vmem:[%s4313_s25 + $0x190] sm:$0xff] %v1748_v10  ;;  %2748 = vst [vmem:[%s4313_s25 + $0x590] sm:$0xff] %v2260_v11  ;;  %v1751_v18 = vadd.f32 %v3389_v16, %v4301_v50  ;;  %v2263_v19 = vadd.f32 %v3517_v17, %v4301_v50  ;;  %v1742_v20 = vpop.f32.mrb[51].mxu0  ;;  %v2254_v21 = vpop.f32.mrb[51].mxu1 }
 0x191   : > { %2618 = vst [vmem:[%s4313_s25 + $0x180] sm:$0xff] %v1740_v14  ;;  %2746 = vst [vmem:[%s4313_s25 + $0x580] sm:$0xff] %v2252_v15  ;;  %v1743_v22 = vadd.f32 %v4301_v50, %v1742_v20  ;;  %v2255_v23 = vadd.f32 %v4301_v50, %v2254_v21 }
 0x192   : > { %2621 = vst [vmem:[%s4313_s25 + $0x198] sm:$0xff] %v1751_v18  ;;  %2749 = vst [vmem:[%s4313_s25 + $0x598] sm:$0xff] %v2263_v19 }
 0x193   : > { %2619 = vst [vmem:[%s4313_s25 + $0x188] sm:$0xff] %v1743_v22  ;;  %2747 = vst [vmem:[%s4313_s25 + $0x588] sm:$0xff] %v2255_v23 }
 0x195   : > { %v3392_v24 = vpop.f32.mrb[52].mxu0  ;;  %v3520_v25 = vpop.f32.mrb[52].mxu1 }
 0x196   : > { %v1764_v26 = vadd.f32 %v3392_v24, %v4301_v50  ;;  %v2276_v27 = vadd.f32 %v3520_v25, %v4301_v50  ;;  %v1755_v28 = vpop.f32.mrb[53].mxu0  ;;  %v2267_v29 = vpop.f32.mrb[53].mxu1 }
 0x197   : > { %v1756_v30 = vadd.f32 %v4301_v50, %v1755_v28  ;;  %v2268_v31 = vadd.f32 %v4301_v50, %v2267_v29  ;;  %v3393_v32 = vpop.f32.mrb[54].mxu0  ;;  %v3521_v33 = vpop.f32.mrb[54].mxu1 }
 0x198   : > { %2624 = vst [vmem:[%s4313_s25 + $0x1b0] sm:$0xff] %v1764_v26  ;;  %2752 = vst [vmem:[%s4313_s25 + $0x5b0] sm:$0xff] %v2276_v27  ;;  %v1767_v34 = vadd.f32 %v3393_v32, %v4301_v50  ;;  %v2279_v35 = vadd.f32 %v3521_v33, %v4301_v50  ;;  %v1758_v36 = vpop.f32.mrb[55].mxu0  ;;  %v2270_v37 = vpop.f32.mrb[55].mxu1 }
 0x199   : > { %2622 = vst [vmem:[%s4313_s25 + $0x1a0] sm:$0xff] %v1756_v30  ;;  %2750 = vst [vmem:[%s4313_s25 + $0x5a0] sm:$0xff] %v2268_v31  ;;  %v1759_v38 = vadd.f32 %v4301_v50, %v1758_v36  ;;  %v2271_v39 = vadd.f32 %v4301_v50, %v2270_v37 }
 0x19a   : > { %2625 = vst [vmem:[%s4313_s25 + $0x1b8] sm:$0xff] %v1767_v34  ;;  %2753 = vst [vmem:[%s4313_s25 + $0x5b8] sm:$0xff] %v2279_v35 }
 0x19b   : > { %2623 = vst [vmem:[%s4313_s25 + $0x1a8] sm:$0xff] %v1759_v38  ;;  %2751 = vst [vmem:[%s4313_s25 + $0x5a8] sm:$0xff] %v2271_v39 }
 0x19d   : > { %v3396_v40 = vpop.f32.mrb[56].mxu0  ;;  %v3524_v41 = vpop.f32.mrb[56].mxu1 }
 0x19e   : > { %v1780_v42 = vadd.f32 %v3396_v40, %v4301_v50  ;;  %v2292_v43 = vadd.f32 %v3524_v41, %v4301_v50  ;;  %v1771_v44 = vpop.f32.mrb[57].mxu0  ;;  %v2283_v45 = vpop.f32.mrb[57].mxu1 }
 0x19f   : > { %v1772_v46 = vadd.f32 %v4301_v50, %v1771_v44  ;;  %v2284_v47 = vadd.f32 %v4301_v50, %v2283_v45  ;;  %v3397_v48 = vpop.f32.mrb[58].mxu0  ;;  %v3525_v49 = vpop.f32.mrb[58].mxu1 }
 0x1a0   : > { %2628 = vst [vmem:[%s4313_s25 + $0x1d0] sm:$0xff] %v1780_v42  ;;  %2756 = vst [vmem:[%s4313_s25 + $0x5d0] sm:$0xff] %v2292_v43  ;;  %v1783_v51 = vadd.f32 %v3397_v48, %v4301_v50  ;;  %v2295_v52 = vadd.f32 %v3525_v49, %v4301_v50  ;;  %v1774_v53 = vpop.f32.mrb[59].mxu0  ;;  %v2286_v54 = vpop.f32.mrb[59].mxu1 }
 0x1a1   : > { %2626 = vst [vmem:[%s4313_s25 + $0x1c0] sm:$0xff] %v1772_v46  ;;  %2754 = vst [vmem:[%s4313_s25 + $0x5c0] sm:$0xff] %v2284_v47  ;;  %v1775_v55 = vadd.f32 %v4301_v50, %v1774_v53  ;;  %v2287_v56 = vadd.f32 %v4301_v50, %v2286_v54 }
 0x1a2   : > { %2629 = vst [vmem:[%s4313_s25 + $0x1d8] sm:$0xff] %v1783_v51  ;;  %2757 = vst [vmem:[%s4313_s25 + $0x5d8] sm:$0xff] %v2295_v52 }
 0x1a3   : > { %2627 = vst [vmem:[%s4313_s25 + $0x1c8] sm:$0xff] %v1775_v55  ;;  %2755 = vst [vmem:[%s4313_s25 + $0x5c8] sm:$0xff] %v2287_v56 }
 0x1a5   : > { %v3400_v57 = vpop.f32.mrb[60].mxu0  ;;  %v3528_v58 = vpop.f32.mrb[60].mxu1 }
 0x1a6   : > { %v1796_v59 = vadd.f32 %v3400_v57, %v4301_v50  ;;  %v2308_v60 = vadd.f32 %v3528_v58, %v4301_v50  ;;  %v1787_v61 = vpop.f32.mrb[61].mxu0  ;;  %v2299_v62 = vpop.f32.mrb[61].mxu1 }
 0x1a7   : > { %v1788_v63 = vadd.f32 %v4301_v50, %v1787_v61  ;;  %v2300_v0 = vadd.f32 %v4301_v50, %v2299_v62  ;;  %v3401_v1 = vpop.f32.mrb[62].mxu0  ;;  %v3529_v2 = vpop.f32.mrb[62].mxu1 }
 0x1a8   : > { %2632 = vst [vmem:[%s4313_s25 + $0x1f0] sm:$0xff] %v1796_v59  ;;  %2760 = vst [vmem:[%s4313_s25 + $0x5f0] sm:$0xff] %v2308_v60  ;;  %v1799_v3 = vadd.f32 %v3401_v1, %v4301_v50  ;;  %v2311_v4 = vadd.f32 %v3529_v2, %v4301_v50  ;;  %v1790_v5 = vpop.f32.mrb[63].mxu0  ;;  %v2302_v6 = vpop.f32.mrb[63].mxu1 }
 0x1a9   : > { %2630 = vst [vmem:[%s4313_s25 + $0x1e0] sm:$0xff] %v1788_v63  ;;  %2758 = vst [vmem:[%s4313_s25 + $0x5e0] sm:$0xff] %v2300_v0  ;;  %v1791_v7 = vadd.f32 %v4301_v50, %v1790_v5  ;;  %v2303_v8 = vadd.f32 %v4301_v50, %v2302_v6 }
 0x1aa   : > { %2633 = vst [vmem:[%s4313_s25 + $0x1f8] sm:$0xff] %v1799_v3  ;;  %2761 = vst [vmem:[%s4313_s25 + $0x5f8] sm:$0xff] %v2311_v4 }
 0x1ab   : > { %2631 = vst [vmem:[%s4313_s25 + $0x1e8] sm:$0xff] %v1791_v7  ;;  %2759 = vst [vmem:[%s4313_s25 + $0x5e8] sm:$0xff] %v2303_v8  ;;  %v4657_v8 = vld [vmem:[#allocation5] ss:$0 sm:$0xff] }
 0x1ad   : > { %v3404_v9 = vpop.f32.mrb[64].mxu0  ;;  %v3532_v10 = vpop.f32.mrb[64].mxu1 }
 0x1ae   : > { %v1812_v11 = vadd.f32 %v3404_v9, %v4301_v50  ;;  %v2324_v12 = vadd.f32 %v3532_v10, %v4301_v50  ;;  %v1803_v13 = vpop.f32.mrb[65].mxu0  ;;  %v2315_v14 = vpop.f32.mrb[65].mxu1 }
 0x1af   : > { %v1804_v15 = vadd.f32 %v4301_v50, %v1803_v13  ;;  %v2316_v16 = vadd.f32 %v4301_v50, %v2315_v14  ;;  %v3405_v17 = vpop.f32.mrb[66].mxu0  ;;  %v3533_v18 = vpop.f32.mrb[66].mxu1 }
 0x1b0   : > { %2636 = vst [vmem:[%s4313_s25 + $0x210] sm:$0xff] %v1812_v11  ;;  %2764 = vst [vmem:[%s4313_s25 + $0x610] sm:$0xff] %v2324_v12  ;;  %v1815_v19 = vadd.f32 %v3405_v17, %v4301_v50  ;;  %v2327_v20 = vadd.f32 %v3533_v18, %v4301_v50  ;;  %v1806_v21 = vpop.f32.mrb[67].mxu0  ;;  %v2318_v22 = vpop.f32.mrb[67].mxu1 }
 0x1b1   : > { %2634 = vst [vmem:[%s4313_s25 + $0x200] sm:$0xff] %v1804_v15  ;;  %2762 = vst [vmem:[%s4313_s25 + $0x600] sm:$0xff] %v2316_v16  ;;  %v1807_v23 = vadd.f32 %v4301_v50, %v1806_v21  ;;  %v2319_v24 = vadd.f32 %v4301_v50, %v2318_v22 }
 0x1b2   : > { %2637 = vst [vmem:[%s4313_s25 + $0x218] sm:$0xff] %v1815_v19  ;;  %2765 = vst [vmem:[%s4313_s25 + $0x618] sm:$0xff] %v2327_v20 }
 0x1b3   : > { %2635 = vst [vmem:[%s4313_s25 + $0x208] sm:$0xff] %v1807_v23  ;;  %2763 = vst [vmem:[%s4313_s25 + $0x608] sm:$0xff] %v2319_v24 }
 0x1b5   : > { %v3408_v25 = vpop.f32.mrb[68].mxu0  ;;  %v3536_v26 = vpop.f32.mrb[68].mxu1 }
 0x1b6   : > { %v1828_v27 = vadd.f32 %v3408_v25, %v4301_v50  ;;  %v2340_v28 = vadd.f32 %v3536_v26, %v4301_v50  ;;  %v1819_v29 = vpop.f32.mrb[69].mxu0  ;;  %v2331_v30 = vpop.f32.mrb[69].mxu1 }
 0x1b7   : > { %v1820_v31 = vadd.f32 %v4301_v50, %v1819_v29  ;;  %v2332_v32 = vadd.f32 %v4301_v50, %v2331_v30  ;;  %v3409_v33 = vpop.f32.mrb[70].mxu0  ;;  %v3537_v34 = vpop.f32.mrb[70].mxu1 }
 0x1b8   : > { %2640 = vst [vmem:[%s4313_s25 + $0x230] sm:$0xff] %v1828_v27  ;;  %2768 = vst [vmem:[%s4313_s25 + $0x630] sm:$0xff] %v2340_v28  ;;  %v1831_v35 = vadd.f32 %v3409_v33, %v4301_v50  ;;  %v2343_v36 = vadd.f32 %v3537_v34, %v4301_v50  ;;  %v1822_v37 = vpop.f32.mrb[71].mxu0  ;;  %v2334_v38 = vpop.f32.mrb[71].mxu1 }
 0x1b9   : > { %2638 = vst [vmem:[%s4313_s25 + $0x220] sm:$0xff] %v1820_v31  ;;  %2766 = vst [vmem:[%s4313_s25 + $0x620] sm:$0xff] %v2332_v32  ;;  %v1823_v39 = vadd.f32 %v4301_v50, %v1822_v37  ;;  %v2335_v40 = vadd.f32 %v4301_v50, %v2334_v38 }
 0x1ba   : > { %2641 = vst [vmem:[%s4313_s25 + $0x238] sm:$0xff] %v1831_v35  ;;  %2769 = vst [vmem:[%s4313_s25 + $0x638] sm:$0xff] %v2343_v36 }
 0x1bb   : > { %2639 = vst [vmem:[%s4313_s25 + $0x228] sm:$0xff] %v1823_v39  ;;  %2767 = vst [vmem:[%s4313_s25 + $0x628] sm:$0xff] %v2335_v40 }
 0x1bd   : > { %v3412_v41 = vpop.f32.mrb[72].mxu0  ;;  %v3540_v42 = vpop.f32.mrb[72].mxu1 }
 0x1be   : > { %v1844_v43 = vadd.f32 %v3412_v41, %v4301_v50  ;;  %v2356_v44 = vadd.f32 %v3540_v42, %v4301_v50  ;;  %v1835_v45 = vpop.f32.mrb[73].mxu0  ;;  %v2347_v46 = vpop.f32.mrb[73].mxu1 }
 0x1bf   : > { %v1836_v47 = vadd.f32 %v4301_v50, %v1835_v45  ;;  %v2348_v48 = vadd.f32 %v4301_v50, %v2347_v46  ;;  %v3413_v49 = vpop.f32.mrb[74].mxu0  ;;  %v3541_v51 = vpop.f32.mrb[74].mxu1 }
 0x1c0   : > { %2644 = vst [vmem:[%s4313_s25 + $0x250] sm:$0xff] %v1844_v43  ;;  %2772 = vst [vmem:[%s4313_s25 + $0x650] sm:$0xff] %v2356_v44  ;;  %v1847_v52 = vadd.f32 %v3413_v49, %v4301_v50  ;;  %v2359_v53 = vadd.f32 %v3541_v51, %v4301_v50  ;;  %v1838_v54 = vpop.f32.mrb[75].mxu0  ;;  %v2350_v55 = vpop.f32.mrb[75].mxu1 }
 0x1c1   : > { %2642 = vst [vmem:[%s4313_s25 + $0x240] sm:$0xff] %v1836_v47  ;;  %2770 = vst [vmem:[%s4313_s25 + $0x640] sm:$0xff] %v2348_v48  ;;  %v1839_v56 = vadd.f32 %v4301_v50, %v1838_v54  ;;  %v2351_v57 = vadd.f32 %v4301_v50, %v2350_v55 }
 0x1c2   : > { %2645 = vst [vmem:[%s4313_s25 + $0x258] sm:$0xff] %v1847_v52  ;;  %2773 = vst [vmem:[%s4313_s25 + $0x658] sm:$0xff] %v2359_v53 }
 0x1c3   : > { %2643 = vst [vmem:[%s4313_s25 + $0x248] sm:$0xff] %v1839_v56  ;;  %2771 = vst [vmem:[%s4313_s25 + $0x648] sm:$0xff] %v2351_v57 }
 0x1c5   : > { %v3416_v58 = vpop.f32.mrb[76].mxu0  ;;  %v3544_v59 = vpop.f32.mrb[76].mxu1 }
 0x1c6   : > { %v1860_v60 = vadd.f32 %v3416_v58, %v4301_v50  ;;  %v2372_v61 = vadd.f32 %v3544_v59, %v4301_v50  ;;  %v1851_v62 = vpop.f32.mrb[77].mxu0  ;;  %v2363_v63 = vpop.f32.mrb[77].mxu1 }
 0x1c7   : > { %v1852_v0 = vadd.f32 %v4301_v50, %v1851_v62  ;;  %v2364_v1 = vadd.f32 %v4301_v50, %v2363_v63  ;;  %v3417_v2 = vpop.f32.mrb[78].mxu0  ;;  %v3545_v3 = vpop.f32.mrb[78].mxu1 }
 0x1c8   : > { %2648 = vst [vmem:[%s4313_s25 + $0x270] sm:$0xff] %v1860_v60  ;;  %2776 = vst [vmem:[%s4313_s25 + $0x670] sm:$0xff] %v2372_v61  ;;  %v1863_v4 = vadd.f32 %v3417_v2, %v4301_v50  ;;  %v2375_v5 = vadd.f32 %v3545_v3, %v4301_v50  ;;  %v1854_v6 = vpop.f32.mrb[79].mxu0  ;;  %v2366_v7 = vpop.f32.mrb[79].mxu1 }
 0x1c9   : > { %2646 = vst [vmem:[%s4313_s25 + $0x260] sm:$0xff] %v1852_v0  ;;  %2774 = vst [vmem:[%s4313_s25 + $0x660] sm:$0xff] %v2364_v1  ;;  %v1855_v9 = vadd.f32 %v4657_v8, %v1854_v6  ;;  %v2367_v10 = vadd.f32 %v4657_v8, %v2366_v7 }
 0x1ca   : > { %2649 = vst [vmem:[%s4313_s25 + $0x278] sm:$0xff] %v1863_v4  ;;  %2777 = vst [vmem:[%s4313_s25 + $0x678] sm:$0xff] %v2375_v5 }
 0x1cb   : > { %2647 = vst [vmem:[%s4313_s25 + $0x268] sm:$0xff] %v1855_v9  ;;  %2775 = vst [vmem:[%s4313_s25 + $0x668] sm:$0xff] %v2367_v10 }
 0x1cd   : > { %v3420_v11 = vpop.f32.mrb[80].mxu0  ;;  %v3548_v12 = vpop.f32.mrb[80].mxu1 }
 0x1ce   : > { %v1876_v50 = vadd.f32 %v4657_v8, %v3420_v11  ;;  %v2388_v13 = vadd.f32 %v4657_v8, %v3548_v12  ;;  %v1867_v14 = vpop.f32.mrb[81].mxu0  ;;  %v2379_v15 = vpop.f32.mrb[81].mxu1 }
 0x1cf   : > { %v1868_v16 = vadd.f32 %v4657_v8, %v1867_v14  ;;  %v2380_v17 = vadd.f32 %v4657_v8, %v2379_v15  ;;  %v3421_v18 = vpop.f32.mrb[82].mxu0  ;;  %v3549_v19 = vpop.f32.mrb[82].mxu1 }
 0x1d0   : > { %2652 = vst [vmem:[%s4313_s25 + $0x290] sm:$0xff] %v1876_v50  ;;  %2780 = vst [vmem:[%s4313_s25 + $0x690] sm:$0xff] %v2388_v13  ;;  %v1879_v20 = vadd.f32 %v4657_v8, %v3421_v18  ;;  %v2391_v21 = vadd.f32 %v4657_v8, %v3549_v19  ;;  %v1870_v22 = vpop.f32.mrb[83].mxu0  ;;  %v2382_v23 = vpop.f32.mrb[83].mxu1 }
 0x1d1   : > { %2650 = vst [vmem:[%s4313_s25 + $0x280] sm:$0xff] %v1868_v16  ;;  %2778 = vst [vmem:[%s4313_s25 + $0x680] sm:$0xff] %v2380_v17  ;;  %v1871_v24 = vadd.f32 %v4657_v8, %v1870_v22  ;;  %v2383_v25 = vadd.f32 %v4657_v8, %v2382_v23 }
 0x1d2   : > { %2653 = vst [vmem:[%s4313_s25 + $0x298] sm:$0xff] %v1879_v20  ;;  %2781 = vst [vmem:[%s4313_s25 + $0x698] sm:$0xff] %v2391_v21 }
 0x1d3   : > { %2651 = vst [vmem:[%s4313_s25 + $0x288] sm:$0xff] %v1871_v24  ;;  %2779 = vst [vmem:[%s4313_s25 + $0x688] sm:$0xff] %v2383_v25 }
 0x1d5   : > { %v3424_v26 = vpop.f32.mrb[84].mxu0  ;;  %v3552_v27 = vpop.f32.mrb[84].mxu1 }
 0x1d6   : > { %v1892_v28 = vadd.f32 %v4657_v8, %v3424_v26  ;;  %v2404_v29 = vadd.f32 %v4657_v8, %v3552_v27  ;;  %v1883_v30 = vpop.f32.mrb[85].mxu0  ;;  %v2395_v31 = vpop.f32.mrb[85].mxu1 }
 0x1d7   : > { %v1884_v32 = vadd.f32 %v4657_v8, %v1883_v30  ;;  %v2396_v33 = vadd.f32 %v4657_v8, %v2395_v31  ;;  %v3425_v34 = vpop.f32.mrb[86].mxu0  ;;  %v3553_v35 = vpop.f32.mrb[86].mxu1 }
 0x1d8   : > { %2656 = vst [vmem:[%s4313_s25 + $0x2b0] sm:$0xff] %v1892_v28  ;;  %2784 = vst [vmem:[%s4313_s25 + $0x6b0] sm:$0xff] %v2404_v29  ;;  %v1895_v36 = vadd.f32 %v4657_v8, %v3425_v34  ;;  %v2407_v37 = vadd.f32 %v4657_v8, %v3553_v35  ;;  %v1886_v38 = vpop.f32.mrb[87].mxu0  ;;  %v2398_v39 = vpop.f32.mrb[87].mxu1 }
 0x1d9   : > { %2654 = vst [vmem:[%s4313_s25 + $0x2a0] sm:$0xff] %v1884_v32  ;;  %2782 = vst [vmem:[%s4313_s25 + $0x6a0] sm:$0xff] %v2396_v33  ;;  %v1887_v40 = vadd.f32 %v4657_v8, %v1886_v38  ;;  %v2399_v41 = vadd.f32 %v4657_v8, %v2398_v39 }
 0x1da   : > { %2657 = vst [vmem:[%s4313_s25 + $0x2b8] sm:$0xff] %v1895_v36  ;;  %2785 = vst [vmem:[%s4313_s25 + $0x6b8] sm:$0xff] %v2407_v37 }
 0x1db   : > { %2655 = vst [vmem:[%s4313_s25 + $0x2a8] sm:$0xff] %v1887_v40  ;;  %2783 = vst [vmem:[%s4313_s25 + $0x6a8] sm:$0xff] %v2399_v41 }
 0x1dd   : > { %v3428_v42 = vpop.f32.mrb[88].mxu0  ;;  %v3556_v43 = vpop.f32.mrb[88].mxu1 }
 0x1de   : > { %v1908_v44 = vadd.f32 %v4657_v8, %v3428_v42  ;;  %v2420_v45 = vadd.f32 %v4657_v8, %v3556_v43  ;;  %v1899_v46 = vpop.f32.mrb[89].mxu0  ;;  %v2411_v47 = vpop.f32.mrb[89].mxu1 }
 0x1df   : > { %v1900_v48 = vadd.f32 %v4657_v8, %v1899_v46  ;;  %v2412_v49 = vadd.f32 %v4657_v8, %v2411_v47  ;;  %v3429_v51 = vpop.f32.mrb[90].mxu0  ;;  %v3557_v52 = vpop.f32.mrb[90].mxu1 }
 0x1e0   : > { %2660 = vst [vmem:[%s4313_s25 + $0x2d0] sm:$0xff] %v1908_v44  ;;  %2788 = vst [vmem:[%s4313_s25 + $0x6d0] sm:$0xff] %v2420_v45  ;;  %v1911_v53 = vadd.f32 %v4657_v8, %v3429_v51  ;;  %v2423_v54 = vadd.f32 %v4657_v8, %v3557_v52  ;;  %v1902_v55 = vpop.f32.mrb[91].mxu0  ;;  %v2414_v56 = vpop.f32.mrb[91].mxu1 }
 0x1e1   : > { %2658 = vst [vmem:[%s4313_s25 + $0x2c0] sm:$0xff] %v1900_v48  ;;  %2786 = vst [vmem:[%s4313_s25 + $0x6c0] sm:$0xff] %v2412_v49  ;;  %v1903_v57 = vadd.f32 %v4657_v8, %v1902_v55  ;;  %v2415_v58 = vadd.f32 %v4657_v8, %v2414_v56 }
 0x1e2   : > { %2661 = vst [vmem:[%s4313_s25 + $0x2d8] sm:$0xff] %v1911_v53  ;;  %2789 = vst [vmem:[%s4313_s25 + $0x6d8] sm:$0xff] %v2423_v54 }
 0x1e3   : > { %2659 = vst [vmem:[%s4313_s25 + $0x2c8] sm:$0xff] %v1903_v57  ;;  %2787 = vst [vmem:[%s4313_s25 + $0x6c8] sm:$0xff] %v2415_v58 }
 0x1e5   : > { %v3432_v59 = vpop.f32.mrb[92].mxu0  ;;  %v3560_v60 = vpop.f32.mrb[92].mxu1 }
 0x1e6   : > { %v1924_v61 = vadd.f32 %v4657_v8, %v3432_v59  ;;  %v2436_v62 = vadd.f32 %v4657_v8, %v3560_v60  ;;  %v1915_v63 = vpop.f32.mrb[93].mxu0  ;;  %v2427_v0 = vpop.f32.mrb[93].mxu1 }
 0x1e7   : > { %v1916_v1 = vadd.f32 %v4657_v8, %v1915_v63  ;;  %v2428_v2 = vadd.f32 %v4657_v8, %v2427_v0  ;;  %v3433_v3 = vpop.f32.mrb[94].mxu0  ;;  %v3561_v4 = vpop.f32.mrb[94].mxu1 }
 0x1e8   : > { %2664 = vst [vmem:[%s4313_s25 + $0x2f0] sm:$0xff] %v1924_v61  ;;  %2792 = vst [vmem:[%s4313_s25 + $0x6f0] sm:$0xff] %v2436_v62  ;;  %v1927_v5 = vadd.f32 %v4657_v8, %v3433_v3  ;;  %v2439_v6 = vadd.f32 %v4657_v8, %v3561_v4  ;;  %v1918_v7 = vpop.f32.mrb[95].mxu0  ;;  %v2430_v9 = vpop.f32.mrb[95].mxu1 }
 0x1e9   : > { %2662 = vst [vmem:[%s4313_s25 + $0x2e0] sm:$0xff] %v1916_v1  ;;  %2790 = vst [vmem:[%s4313_s25 + $0x6e0] sm:$0xff] %v2428_v2  ;;  %v1919_v10 = vadd.f32 %v4657_v8, %v1918_v7  ;;  %v2431_v11 = vadd.f32 %v4657_v8, %v2430_v9 }
 0x1ea   : > { %2665 = vst [vmem:[%s4313_s25 + $0x2f8] sm:$0xff] %v1927_v5  ;;  %2793 = vst [vmem:[%s4313_s25 + $0x6f8] sm:$0xff] %v2439_v6 }
 0x1eb   : > { %2663 = vst [vmem:[%s4313_s25 + $0x2e8] sm:$0xff] %v1919_v10  ;;  %2791 = vst [vmem:[%s4313_s25 + $0x6e8] sm:$0xff] %v2431_v11 }
 0x1ed   : > { %v3436_v12 = vpop.f32.mrb[96].mxu0  ;;  %v3564_v50 = vpop.f32.mrb[96].mxu1 }
 0x1ee   : > { %v1940_v13 = vadd.f32 %v4657_v8, %v3436_v12  ;;  %v2452_v14 = vadd.f32 %v4657_v8, %v3564_v50  ;;  %v1931_v15 = vpop.f32.mrb[97].mxu0  ;;  %v2443_v16 = vpop.f32.mrb[97].mxu1 }
 0x1ef   : > { %v1932_v17 = vadd.f32 %v4657_v8, %v1931_v15  ;;  %v2444_v18 = vadd.f32 %v4657_v8, %v2443_v16  ;;  %v3437_v19 = vpop.f32.mrb[98].mxu0  ;;  %v3565_v20 = vpop.f32.mrb[98].mxu1 }
 0x1f0   : > { %2668 = vst [vmem:[%s4313_s25 + $0x310] sm:$0xff] %v1940_v13  ;;  %2796 = vst [vmem:[%s4313_s25 + $0x710] sm:$0xff] %v2452_v14  ;;  %v1943_v21 = vadd.f32 %v4657_v8, %v3437_v19  ;;  %v2455_v22 = vadd.f32 %v4657_v8, %v3565_v20  ;;  %v1934_v23 = vpop.f32.mrb[99].mxu0  ;;  %v2446_v24 = vpop.f32.mrb[99].mxu1 }
 0x1f1   : > { %2666 = vst [vmem:[%s4313_s25 + $0x300] sm:$0xff] %v1932_v17  ;;  %2794 = vst [vmem:[%s4313_s25 + $0x700] sm:$0xff] %v2444_v18  ;;  %v1935_v25 = vadd.f32 %v4657_v8, %v1934_v23  ;;  %v2447_v26 = vadd.f32 %v4657_v8, %v2446_v24 }
 0x1f2   : > { %2669 = vst [vmem:[%s4313_s25 + $0x318] sm:$0xff] %v1943_v21  ;;  %2797 = vst [vmem:[%s4313_s25 + $0x718] sm:$0xff] %v2455_v22 }
 0x1f3   : > { %2667 = vst [vmem:[%s4313_s25 + $0x308] sm:$0xff] %v1935_v25  ;;  %2795 = vst [vmem:[%s4313_s25 + $0x708] sm:$0xff] %v2447_v26 }
 0x1f5   : > { %v3440_v27 = vpop.f32.mrb[100].mxu0  ;;  %v3568_v28 = vpop.f32.mrb[100].mxu1 }
 0x1f6   : > { %v1956_v29 = vadd.f32 %v4657_v8, %v3440_v27  ;;  %v2468_v30 = vadd.f32 %v4657_v8, %v3568_v28  ;;  %v1947_v31 = vpop.f32.mrb[101].mxu0  ;;  %v2459_v32 = vpop.f32.mrb[101].mxu1 }
 0x1f7   : > { %v1948_v33 = vadd.f32 %v4657_v8, %v1947_v31  ;;  %v2460_v34 = vadd.f32 %v4657_v8, %v2459_v32  ;;  %v3441_v35 = vpop.f32.mrb[102].mxu0  ;;  %v3569_v36 = vpop.f32.mrb[102].mxu1 }
 0x1f8   : > { %2672 = vst [vmem:[%s4313_s25 + $0x330] sm:$0xff] %v1956_v29  ;;  %2800 = vst [vmem:[%s4313_s25 + $0x730] sm:$0xff] %v2468_v30  ;;  %v1959_v37 = vadd.f32 %v4657_v8, %v3441_v35  ;;  %v2471_v38 = vadd.f32 %v4657_v8, %v3569_v36  ;;  %v1950_v39 = vpop.f32.mrb[103].mxu0  ;;  %v2462_v40 = vpop.f32.mrb[103].mxu1 }
 0x1f9   : > { %2670 = vst [vmem:[%s4313_s25 + $0x320] sm:$0xff] %v1948_v33  ;;  %2798 = vst [vmem:[%s4313_s25 + $0x720] sm:$0xff] %v2460_v34  ;;  %v1951_v41 = vadd.f32 %v4657_v8, %v1950_v39  ;;  %v2463_v42 = vadd.f32 %v4657_v8, %v2462_v40 }
 0x1fa   : > { %2673 = vst [vmem:[%s4313_s25 + $0x338] sm:$0xff] %v1959_v37  ;;  %2801 = vst [vmem:[%s4313_s25 + $0x738] sm:$0xff] %v2471_v38 }
 0x1fb   : > { %2671 = vst [vmem:[%s4313_s25 + $0x328] sm:$0xff] %v1951_v41  ;;  %2799 = vst [vmem:[%s4313_s25 + $0x728] sm:$0xff] %v2463_v42 }
 0x1fd   : > { %v3444_v43 = vpop.f32.mrb[104].mxu0  ;;  %v3572_v44 = vpop.f32.mrb[104].mxu1 }
 0x1fe   : > { %v1972_v45 = vadd.f32 %v4657_v8, %v3444_v43  ;;  %v2484_v46 = vadd.f32 %v4657_v8, %v3572_v44  ;;  %v1963_v47 = vpop.f32.mrb[105].mxu0  ;;  %v2475_v48 = vpop.f32.mrb[105].mxu1 }
 0x1ff   : > { %v1964_v49 = vadd.f32 %v4657_v8, %v1963_v47  ;;  %v2476_v51 = vadd.f32 %v4657_v8, %v2475_v48  ;;  %v3445_v52 = vpop.f32.mrb[106].mxu0  ;;  %v3573_v53 = vpop.f32.mrb[106].mxu1 }
 0x200   : > { %2676 = vst [vmem:[%s4313_s25 + $0x350] sm:$0xff] %v1972_v45  ;;  %2804 = vst [vmem:[%s4313_s25 + $0x750] sm:$0xff] %v2484_v46  ;;  %v1975_v54 = vadd.f32 %v4657_v8, %v3445_v52  ;;  %v2487_v55 = vadd.f32 %v4657_v8, %v3573_v53  ;;  %v1966_v56 = vpop.f32.mrb[107].mxu0  ;;  %v2478_v57 = vpop.f32.mrb[107].mxu1 }
 0x201   : > { %2674 = vst [vmem:[%s4313_s25 + $0x340] sm:$0xff] %v1964_v49  ;;  %2802 = vst [vmem:[%s4313_s25 + $0x740] sm:$0xff] %v2476_v51  ;;  %v1967_v58 = vadd.f32 %v4657_v8, %v1966_v56  ;;  %v2479_v59 = vadd.f32 %v4657_v8, %v2478_v57 }
 0x202   : > { %2677 = vst [vmem:[%s4313_s25 + $0x358] sm:$0xff] %v1975_v54  ;;  %2805 = vst [vmem:[%s4313_s25 + $0x758] sm:$0xff] %v2487_v55 }
 0x203   : > { %2675 = vst [vmem:[%s4313_s25 + $0x348] sm:$0xff] %v1967_v58  ;;  %2803 = vst [vmem:[%s4313_s25 + $0x748] sm:$0xff] %v2479_v59 }
 0x205   : > { %v3448_v60 = vpop.f32.mrb[108].mxu0  ;;  %v3576_v61 = vpop.f32.mrb[108].mxu1 }
 0x206   : > { %v1988_v62 = vadd.f32 %v4657_v8, %v3448_v60  ;;  %v2500_v63 = vadd.f32 %v4657_v8, %v3576_v61  ;;  %v1979_v0 = vpop.f32.mrb[109].mxu0  ;;  %v2491_v1 = vpop.f32.mrb[109].mxu1 }
 0x207   : > { %v1980_v2 = vadd.f32 %v4657_v8, %v1979_v0  ;;  %v2492_v3 = vadd.f32 %v4657_v8, %v2491_v1  ;;  %v3449_v4 = vpop.f32.mrb[110].mxu0  ;;  %v3577_v5 = vpop.f32.mrb[110].mxu1 }
 0x208   : > { %2680 = vst [vmem:[%s4313_s25 + $0x370] sm:$0xff] %v1988_v62  ;;  %2808 = vst [vmem:[%s4313_s25 + $0x770] sm:$0xff] %v2500_v63  ;;  %v1991_v6 = vadd.f32 %v4657_v8, %v3449_v4  ;;  %v2503_v7 = vadd.f32 %v4657_v8, %v3577_v5  ;;  %v1982_v9 = vpop.f32.mrb[111].mxu0  ;;  %v2494_v10 = vpop.f32.mrb[111].mxu1 }
 0x209   : > { %2678 = vst [vmem:[%s4313_s25 + $0x360] sm:$0xff] %v1980_v2  ;;  %2806 = vst [vmem:[%s4313_s25 + $0x760] sm:$0xff] %v2492_v3  ;;  %v1983_v11 = vadd.f32 %v4657_v8, %v1982_v9  ;;  %v2495_v12 = vadd.f32 %v4657_v8, %v2494_v10 }
 0x20a   : > { %2681 = vst [vmem:[%s4313_s25 + $0x378] sm:$0xff] %v1991_v6  ;;  %2809 = vst [vmem:[%s4313_s25 + $0x778] sm:$0xff] %v2503_v7 }
 0x20b   : > { %2679 = vst [vmem:[%s4313_s25 + $0x368] sm:$0xff] %v1983_v11  ;;  %2807 = vst [vmem:[%s4313_s25 + $0x768] sm:$0xff] %v2495_v12 }
 0x20d   : > { %v3452_v50 = vpop.f32.mrb[112].mxu0  ;;  %v3580_v13 = vpop.f32.mrb[112].mxu1 }
 0x20e   : > { %v2004_v14 = vadd.f32 %v4657_v8, %v3452_v50  ;;  %v2516_v15 = vadd.f32 %v4657_v8, %v3580_v13  ;;  %v1995_v16 = vpop.f32.mrb[113].mxu0  ;;  %v2507_v17 = vpop.f32.mrb[113].mxu1 }
 0x20f   : > { %v1996_v18 = vadd.f32 %v4657_v8, %v1995_v16  ;;  %v2508_v19 = vadd.f32 %v4657_v8, %v2507_v17  ;;  %v3453_v20 = vpop.f32.mrb[114].mxu0  ;;  %v3581_v21 = vpop.f32.mrb[114].mxu1 }
 0x210   : > { %2684 = vst [vmem:[%s4313_s25 + $0x390] sm:$0xff] %v2004_v14  ;;  %2812 = vst [vmem:[%s4313_s25 + $0x790] sm:$0xff] %v2516_v15  ;;  %v2007_v22 = vadd.f32 %v4657_v8, %v3453_v20  ;;  %v2519_v23 = vadd.f32 %v4657_v8, %v3581_v21  ;;  %v1998_v24 = vpop.f32.mrb[115].mxu0  ;;  %v2510_v25 = vpop.f32.mrb[115].mxu1 }
 0x211   : > { %2682 = vst [vmem:[%s4313_s25 + $0x380] sm:$0xff] %v1996_v18  ;;  %2810 = vst [vmem:[%s4313_s25 + $0x780] sm:$0xff] %v2508_v19  ;;  %v1999_v26 = vadd.f32 %v4657_v8, %v1998_v24  ;;  %v2511_v27 = vadd.f32 %v4657_v8, %v2510_v25 }
 0x212   : > { %2685 = vst [vmem:[%s4313_s25 + $0x398] sm:$0xff] %v2007_v22  ;;  %2813 = vst [vmem:[%s4313_s25 + $0x798] sm:$0xff] %v2519_v23 }
 0x213   : > { %2683 = vst [vmem:[%s4313_s25 + $0x388] sm:$0xff] %v1999_v26  ;;  %2811 = vst [vmem:[%s4313_s25 + $0x788] sm:$0xff] %v2511_v27 }
 0x215   : > { %v3456_v28 = vpop.f32.mrb[116].mxu0  ;;  %v3584_v29 = vpop.f32.mrb[116].mxu1 }
 0x216   : > { %v2020_v30 = vadd.f32 %v4657_v8, %v3456_v28  ;;  %v2532_v31 = vadd.f32 %v4657_v8, %v3584_v29  ;;  %v2011_v32 = vpop.f32.mrb[117].mxu0  ;;  %v2523_v33 = vpop.f32.mrb[117].mxu1 }
 0x217   : > { %v2012_v34 = vadd.f32 %v4657_v8, %v2011_v32  ;;  %v2524_v35 = vadd.f32 %v4657_v8, %v2523_v33  ;;  %v3457_v36 = vpop.f32.mrb[118].mxu0  ;;  %v3585_v37 = vpop.f32.mrb[118].mxu1 }
 0x218   : > { %2688 = vst [vmem:[%s4313_s25 + $0x3b0] sm:$0xff] %v2020_v30  ;;  %2816 = vst [vmem:[%s4313_s25 + $0x7b0] sm:$0xff] %v2532_v31  ;;  %v2023_v38 = vadd.f32 %v4657_v8, %v3457_v36  ;;  %v2535_v39 = vadd.f32 %v4657_v8, %v3585_v37  ;;  %v2014_v40 = vpop.f32.mrb[119].mxu0  ;;  %v2526_v41 = vpop.f32.mrb[119].mxu1 }
 0x219   : > { %2686 = vst [vmem:[%s4313_s25 + $0x3a0] sm:$0xff] %v2012_v34  ;;  %2814 = vst [vmem:[%s4313_s25 + $0x7a0] sm:$0xff] %v2524_v35  ;;  %v2015_v42 = vadd.f32 %v4657_v8, %v2014_v40  ;;  %v2527_v43 = vadd.f32 %v4657_v8, %v2526_v41 }
 0x21a   : > { %2689 = vst [vmem:[%s4313_s25 + $0x3b8] sm:$0xff] %v2023_v38  ;;  %2817 = vst [vmem:[%s4313_s25 + $0x7b8] sm:$0xff] %v2535_v39 }
 0x21b   : > { %2687 = vst [vmem:[%s4313_s25 + $0x3a8] sm:$0xff] %v2015_v42  ;;  %2815 = vst [vmem:[%s4313_s25 + $0x7a8] sm:$0xff] %v2527_v43 }
 0x21d   : > { %v3460_v44 = vpop.f32.mrb[120].mxu0  ;;  %v3588_v45 = vpop.f32.mrb[120].mxu1 }
 0x21e   : > { %v2036_v46 = vadd.f32 %v4657_v8, %v3460_v44  ;;  %v2548_v47 = vadd.f32 %v4657_v8, %v3588_v45  ;;  %v2027_v48 = vpop.f32.mrb[121].mxu0  ;;  %v2539_v49 = vpop.f32.mrb[121].mxu1 }
 0x21f   : > { %v2028_v51 = vadd.f32 %v4657_v8, %v2027_v48  ;;  %v2540_v52 = vadd.f32 %v4657_v8, %v2539_v49  ;;  %v3461_v53 = vpop.f32.mrb[122].mxu0  ;;  %v3589_v54 = vpop.f32.mrb[122].mxu1 }
 0x220   : > { %2692 = vst [vmem:[%s4313_s25 + $0x3d0] sm:$0xff] %v2036_v46  ;;  %2820 = vst [vmem:[%s4313_s25 + $0x7d0] sm:$0xff] %v2548_v47  ;;  %v2039_v55 = vadd.f32 %v4657_v8, %v3461_v53  ;;  %v2551_v56 = vadd.f32 %v4657_v8, %v3589_v54  ;;  %v2030_v57 = vpop.f32.mrb[123].mxu0  ;;  %v2542_v58 = vpop.f32.mrb[123].mxu1 }
 0x221   : > { %2690 = vst [vmem:[%s4313_s25 + $0x3c0] sm:$0xff] %v2028_v51  ;;  %2818 = vst [vmem:[%s4313_s25 + $0x7c0] sm:$0xff] %v2540_v52  ;;  %v2031_v59 = vadd.f32 %v4657_v8, %v2030_v57  ;;  %v2543_v60 = vadd.f32 %v4657_v8, %v2542_v58 }
 0x222   : > { %2693 = vst [vmem:[%s4313_s25 + $0x3d8] sm:$0xff] %v2039_v55  ;;  %2821 = vst [vmem:[%s4313_s25 + $0x7d8] sm:$0xff] %v2551_v56 }
 0x223   : > { %2691 = vst [vmem:[%s4313_s25 + $0x3c8] sm:$0xff] %v2031_v59  ;;  %2819 = vst [vmem:[%s4313_s25 + $0x7c8] sm:$0xff] %v2543_v60 }
 0x225   : > { %v3464_v61 = vpop.f32.mrb[124].mxu0  ;;  %v3592_v62 = vpop.f32.mrb[124].mxu1 }
 0x226   : > { %v2052_v63 = vadd.f32 %v4657_v8, %v3464_v61  ;;  %v2564_v0 = vadd.f32 %v4657_v8, %v3592_v62  ;;  %v2043_v1 = vpop.f32.mrb[125].mxu0  ;;  %v2555_v2 = vpop.f32.mrb[125].mxu1 }
 0x227   : > { %v2044_v3 = vadd.f32 %v4657_v8, %v2043_v1  ;;  %v2556_v4 = vadd.f32 %v4657_v8, %v2555_v2  ;;  %v3465_v5 = vpop.f32.mrb[126].mxu0  ;;  %v3593_v6 = vpop.f32.mrb[126].mxu1 }
 0x228   : > { %2696 = vst [vmem:[%s4313_s25 + $0x3f0] sm:$0xff] %v2052_v63  ;;  %2824 = vst [vmem:[%s4313_s25 + $0x7f0] sm:$0xff] %v2564_v0  ;;  %v2055_v7 = vadd.f32 %v4657_v8, %v3465_v5  ;;  %v2567_v9 = vadd.f32 %v4657_v8, %v3593_v6  ;;  %v2046_v10 = vpop.f32.mrb[127].mxu0  ;;  %v2558_v11 = vpop.f32.mrb[127].mxu1 }
 0x229   : > { %2694 = vst [vmem:[%s4313_s25 + $0x3e0] sm:$0xff] %v2044_v3  ;;  %2822 = vst [vmem:[%s4313_s25 + $0x7e0] sm:$0xff] %v2556_v4  ;;  %v2047_v12 = vadd.f32 %v4657_v8, %v2046_v10  ;;  %v2559_v50 = vadd.f32 %v4657_v8, %v2558_v11 }
 0x22a   : > { %2697 = vst [vmem:[%s4313_s25 + $0x3f8] sm:$0xff] %v2055_v7  ;;  %2825 = vst [vmem:[%s4313_s25 + $0x7f8] sm:$0xff] %v2567_v9 }
 0x22b   : > { %2695 = vst [vmem:[%s4313_s25 + $0x3e8] sm:$0xff] %v2047_v12  ;;  %2823 = vst [vmem:[%s4313_s25 + $0x7e8] sm:$0xff] %v2559_v50 }
 0x22c   : > { %3867 = shalt.err (!%p3864_p11)
}
 0x22d   : > { %s3868_s10 = scalar_lea.hbm %s4854_s5, 32768  ;;  %s3872_s11 = scalar_lea.hbm %s4912_s3, 65536 }
 0x22e   : > { %p3869_p13 = scmp.ne.s32.totalorder %s4854_s5, %s3868_s10  ;;  %p3873_p6 = scmp.lt.u32.totalorder %s4854_s5, %s4912_s3 }
 0x22f   : > { %p3874_p9 = scmp.lt.u32.totalorder %s3872_s11, %s3868_s10  ;;  %p3876_p12 = scmp.lt.u32.totalorder %s3868_s10, %s4854_s5 }
 0x230   : > { %p3870_p0 = pnand %p3869_p13, %p4925_p1 }
 0x231   : > { %p3875_p10 = por %p3874_p9, %p3873_p6 }
 0x232   : > { %p3871_p5 = pneg %p3870_p0 }
 0x233   : > { %p3877_p2 = por %p3876_p12, %p3875_p10 }
 0x235   : > { %p3878_p3 = pnand %p3877_p2, %p3871_p5 }
 0x237   : > { %3881 = shalt.err (!%p3878_p3)
}
 0x238   : > { %s3931_s19 = smov 128   ;;  %s3932_s20 = smov 8  }
 0x239   : > { %3610 = dma.vmem_to_hbm [thread:$0]  (%p4925_p1), %s4856_s30, 32768, %s4854_s5, %s4868_s6, %s3931_s19, %s3931_s19, %s3932_s20  }
 0x23a PF: > { %p3627_p4 = scmp.ge.s32.totalorder %s3924_s15, 2  ;;  %s2855_s25 = sand.u32 1, %s3912_s12  }
 0x23b   : > { %p4926_p7 = scmp.ne.s32.totalorder %s4917_s23, 0  ;;  %s2856_s28 = scalar_lea.sflag [#allocation4], %s2855_s25 }
 0x23d   : > { %p3620_p8 = pnand %p3627_p4, %p4926_p7 }
 0x23f   : > { %3907 = dma.done.wait (!%p3620_p8), %s2856_s28, 32768  }
 0x240   : > { %3909 = vsyncadd (!%p3620_p8), %s2856_s28, 4294934528  ;;  %p15_p11 = scmp.ge.s32.totalorder %s3978_s18, 4   ;;  %s4927_s12 = smov %s3916_s13 }
 0x241   : > { %s4928_s13 = smov %s3920_s14  ;;  %s4929_s14 = smov %s3989_s21 }
 0x242   : > { %s4930_s15 = smov %s3978_s18  ;;  %17 = sbr.rel (!%p15_p11) target bundleno = 5 (0x5), region = 76 }
 0x249   :  { %2861 = vsyncpa [#allocation3], 1 }
 0x24a   :  { %2863 = vsyncpa [#allocation3 + $0x1], 1 }
 0x24b   :  { %2864 = vsyncpa [#allocation6], 1 }
 0x24c   :  { %2865 = vsyncpa [#allocation4], 1 }
 0x24d   :  { %2867 = vsyncpa [#allocation4 + $0x1], 1 }

</bundles_post_ra>
